<compile_context>
chip_gen: v7x
topology: tpu7x:2x2x1
jax: 0.10.0
libtpu: 0.0.40
codegen_flags: <defaults>
</compile_context>

<pallas_src>
import functools

import jax
import jax.numpy as jnp
from jax import lax
from jax.experimental import pallas as pl
from jax.experimental.pallas import tpu as pltpu


def _self_att_kernel(gamma_ref, x_ref, w_ref, b_ref, out_ref, *, Cq, Cq_pad, C):
    # x_ref block: (1, C, N)  -> x: (C, N), lane-dense (N on lanes).
    x = x_ref[0]

    # Fused projection: one (Ctot, C) @ (C, N) matmul + bias, instead of three
    # tiny latency-bound matmuls.  Rows: [q | pad | k | pad | v] (8-aligned).
    proj = jnp.dot(w_ref[...], x, preferred_element_type=jnp.float32) + b_ref[...]
    q = proj[0:Cq, :]                            # (Cq, N)
    k = proj[Cq_pad:Cq_pad + Cq, :]              # (Cq, N)
    v = proj[2 * Cq_pad:2 * Cq_pad + C, :]       # (C,  N)

    # energy[i, j] = <q[:, i], k[:, j]>  == torch.bmm(Q^T, K).
    # Only the tiny (Cq, N) q needs a relayout; k is consumed untransposed.
    # K = Cq is padding-bound on the MXU, so keep this dot in f32.
    energy = jnp.dot(q.T, k, preferred_element_type=jnp.float32)        # (N, N)

    # Row softmax: elementwise math in f32, normalizer via EUP approx reciprocal
    # (frees the VALU slot that a full (N, N) divide would occupy).
    m = jnp.max(energy, axis=-1, keepdims=True)
    p = jnp.exp(energy - m)
    att = p * pl.reciprocal(jnp.sum(p, axis=-1, keepdims=True), approx=True)

    # out[c, i] = sum_j v[c, j] * att[i, j]  == torch.bmm(V, att^T).
    # trans_b form -> MXU consumes att transposed (no explicit relayout);
    # bf16 operands at the MXU boundary, f32 accumulation.
    o = lax.dot_general(
        v.astype(jnp.bfloat16), att.astype(jnp.bfloat16),
        (((1,), (1,)), ((), ())),
        preferred_element_type=jnp.float32)                              # (C, N)

    # Residual: gamma * out + x, stored as a lane-dense (C, N) slab.
    out_ref[0] = gamma_ref[0] * o + x


def self_att_block_pallas(x_nchw, params):
    """x_nchw: (B, C, W, H) float32. params: dict of wq/bq/wk/bk/wv/bv/gamma."""
    B, C, W, H = x_nchw.shape
    N = W * H
    Cq = params["wq"].shape[1]
    Cq_pad = ((Cq + 7) // 8) * 8          # align q/k segments to 8 sublanes
    Ctot = 2 * Cq_pad + C

    # Pack [wq | wk | wv] (as (Cout, Cin)) into one aligned weight slab + bias.
    def pad_rows(a, rows):
        return jnp.pad(a, ((0, rows - a.shape[0]), (0, 0)))

    w_all = jnp.concatenate([
        pad_rows(params["wq"].T.astype(jnp.float32), Cq_pad),
        pad_rows(params["wk"].T.astype(jnp.float32), Cq_pad),
        params["wv"].T.astype(jnp.float32),
    ], axis=0)                                                  # (Ctot, C)
    b_all = jnp.concatenate([
        pad_rows(params["bq"].reshape(-1, 1).astype(jnp.float32), Cq_pad),
        pad_rows(params["bk"].reshape(-1, 1).astype(jnp.float32), Cq_pad),
        params["bv"].reshape(-1, 1).astype(jnp.float32),
    ], axis=0)                                                  # (Ctot, 1)

    # NCHW -> (B, C, N) is a pure reshape (no HBM transpose pass).
    x_cn = x_nchw.reshape(B, C, N).astype(jnp.float32)
    gamma = jnp.asarray(params["gamma"], jnp.float32).reshape(1)

    cost = pl.CostEstimate(
        flops=2 * B * (Ctot * C * N + N * N * Cq + N * N * C),
        transcendentals=B * N * N,
        bytes_accessed=4 * (2 * B * C * N + Ctot * C + Ctot + 1),
    )

    kernel = functools.partial(_self_att_kernel, Cq=Cq, Cq_pad=Cq_pad, C=C)

    out_cn = pl.pallas_call(
        kernel,
        out_shape=jax.ShapeDtypeStruct((B, C, N), jnp.float32),
        grid=(B,),
        in_specs=[
            pl.BlockSpec(memory_space=pltpu.MemorySpace.SMEM),     # gamma (scalar)
            pl.BlockSpec((1, C, N), lambda b: (b, 0, 0)),          # x, per-batch slab
            pl.BlockSpec((Ctot, C), lambda b: (0, 0)),             # fused weights
            pl.BlockSpec((Ctot, 1), lambda b: (0, 0)),             # fused biases
        ],
        out_specs=pl.BlockSpec((1, C, N), lambda b: (b, 0, 0)),
        compiler_params=pltpu.CompilerParams(dimension_semantics=("parallel",)),
        cost_estimate=cost,
    )(gamma, x_cn, w_all, b_all)

    # TODO(synk): at much larger spatial sizes the monolithic (N, N) energy tile
    # should be flash-style tiled over key blocks (v7x 64 MiB VMEM cliff).
    return out_cn.reshape(B, C, W, H)


def self_att_block_ref(x, params):
    """Pure-JAX reference mirroring the PyTorch forward (NCHW)."""
    B, C, W, H = x.shape
    N = W * H
    xf = x.reshape(B, C, N).astype(jnp.float32)
    wq, bq = params["wq"], params["bq"]          # wq: (C, Cq), bq: (1, Cq)
    wk, bk = params["wk"], params["bk"]
    wv, bv = params["wv"], params["bv"]
    gamma = jnp.float32(params["gamma"])

    q = jnp.einsum("co,bcn->bon", wq, xf) + bq.reshape(1, -1, 1)        # (B, Cq, N)
    k = jnp.einsum("co,bcn->bon", wk, xf) + bk.reshape(1, -1, 1)        # (B, Cq, N)
    v = jnp.einsum("co,bcn->bon", wv, xf) + bv.reshape(1, -1, 1)        # (B, C, N)

    energy = jnp.einsum("boi,boj->bij", q, k)                           # (B, N, N)
    att = jax.nn.softmax(energy, axis=-1)
    out = jnp.einsum("bcj,bij->bci", v, att)                            # (B, C, N)
    out = out.reshape(B, C, W, H)
    return gamma * out + x


if __name__ == "__main__":
    B, C, W, H = 2, 16, 16, 16
    reduction = 8
    Cq = C // reduction

    key = jax.random.PRNGKey(0)
    kx, kq, kk, kv, kbq, kbk, kbv = jax.random.split(key, 7)

    x = jax.random.normal(kx, (B, C, W, H), dtype=jnp.float32)

    # Conv2d 1x1 weights stored channels-last: (Cin, Cout).
    # NOTE: the PyTorch module initializes gamma to 0; we use a nonzero gamma
    # here so the attention path is actually exercised.
    scale = 0.1
    params = {
        "wq": scale * jax.random.normal(kq, (C, Cq), dtype=jnp.float32),
        "bq": scale * jax.random.normal(kbq, (1, Cq), dtype=jnp.float32),
        "wk": scale * jax.random.normal(kk, (C, Cq), dtype=jnp.float32),
        "bk": scale * jax.random.normal(kbk, (1, Cq), dtype=jnp.float32),
        "wv": scale * jax.random.normal(kv, (C, C), dtype=jnp.float32),
        "bv": scale * jax.random.normal(kbv, (1, C), dtype=jnp.float32),
        "gamma": 0.5,
    }

    out = jax.block_until_ready(self_att_block_pallas(x, params))
    ref = jax.block_until_ready(self_att_block_ref(x, params))

    assert out.shape == x.shape and out.dtype == jnp.float32
    # bf16-at-MXU (att @ v) + EUP approx reciprocal -> loosened tolerance.
    max_err = float(jnp.max(jnp.abs(out - ref)))
    assert jnp.allclose(out, ref, atol=2e-2, rtol=2e-2), max_err
    print("KERNEL_OK")
</pallas_src>

<mosaic_0001>
module attributes {stable_mosaic.version = 11 : i64} {
  func.func @_self_att_kernel(%arg0: i32, %arg1: memref<1xf32, #tpu.memory_space<smem>>, %arg2: memref<1x16x256xf32, #tpu.memory_space<vmem>>, %arg3: memref<32x16xf32, #tpu.memory_space<vmem>>, %arg4: memref<32x1xf32, #tpu.memory_space<vmem>>, %arg5: memref<1x16x256xf32, #tpu.memory_space<vmem>>) attributes {dimension_semantics = [#tpu.dimension_semantics<parallel>], iteration_bounds = array<i64: 2>, scalar_prefetch = 0 : i64, scratch_operands = 0 : i64, tpu.core_type = #tpu.core_type<tc>, window_params = [{transform_indices = @transform_0, window_bounds = array<i64: 1>}, {transform_indices = @transform_1, window_bounds = array<i64: 1, 16, 256>}, {pipeline_mode = #tpu.pipeline_mode<synchronous>, transform_indices = @transform_2, window_bounds = array<i64: 32, 16>}, {pipeline_mode = #tpu.pipeline_mode<synchronous>, transform_indices = @transform_3, window_bounds = array<i64: 32, 1>}, {transform_indices = @transform_4, window_bounds = array<i64: 1, 16, 256>}]} {
    %c0 = arith.constant 0 : index
    %c0_0 = arith.constant 0 : index
    %c0_1 = arith.constant 0 : index
    %0 = vector.load %arg2[%c0, %c0_0, %c0_1] : memref<1x16x256xf32, #tpu.memory_space<vmem>>, vector<1x16x256xf32>
    %1 = vector.shape_cast %0 : vector<1x16x256xf32> to vector<16x256xf32>
    %c0_2 = arith.constant 0 : index
    %c0_3 = arith.constant 0 : index
    %2 = vector.load %arg3[%c0_2, %c0_3] : memref<32x16xf32, #tpu.memory_space<vmem>>, vector<32x16xf32>
    %cst = arith.constant dense<0.000000e+00> : vector<32x256xf32>
    %3 = tpu.matmul %2, %1, %cst {dimension_numbers = #tpu.dot_dimension_numbers<[1], [0], [0], [1], [0, 0, 1, 1], [], []>} : vector<32x16xf32>, vector<16x256xf32>, vector<32x256xf32> -> vector<32x256xf32>
    %c0_4 = arith.constant 0 : index
    %c0_5 = arith.constant 0 : index
    %4 = vector.load %arg4[%c0_4, %c0_5] : memref<32x1xf32, #tpu.memory_space<vmem>>, vector<32x1xf32>
    %5 = vector.broadcast %4 : vector<32x1xf32> to vector<32x256xf32>
    %6 = arith.addf %3, %5 : vector<32x256xf32>
    %7 = vector.extract_strided_slice %6 {offsets = [0, 0], sizes = [2, 256], strides = [1, 1]} : vector<32x256xf32> to vector<2x256xf32>
    %8 = vector.extract_strided_slice %6 {offsets = [8, 0], sizes = [2, 256], strides = [1, 1]} : vector<32x256xf32> to vector<2x256xf32>
    %9 = vector.extract_strided_slice %6 {offsets = [16, 0], sizes = [16, 256], strides = [1, 1]} : vector<32x256xf32> to vector<16x256xf32>
    %10 = tpu.transpose %7, [1, 0] : vector<2x256xf32> -> vector<256x2xf32>
    %cst_6 = arith.constant dense<0.000000e+00> : vector<256x256xf32>
    %11 = tpu.matmul %10, %8, %cst_6 {dimension_numbers = #tpu.dot_dimension_numbers<[1], [0], [0], [1], [0, 0, 1, 1], [], []>} : vector<256x2xf32>, vector<2x256xf32>, vector<256x256xf32> -> vector<256x256xf32>
    %cst_7 = arith.constant dense<0xFF800000> : vector<256xf32>
    %12 = vector.multi_reduction <maximumf>, %11, %cst_7 [1] : vector<256x256xf32> to vector<256xf32>
    %13 = vector.shape_cast %12 : vector<256xf32> to vector<256x1xf32>
    %14 = vector.broadcast %13 : vector<256x1xf32> to vector<256x256xf32>
    %15 = arith.subf %11, %14 : vector<256x256xf32>
    %16 = math.exp %15 : vector<256x256xf32>
    %cst_8 = arith.constant dense<0.000000e+00> : vector<256xf32>
    %17 = vector.multi_reduction <add>, %16, %cst_8 [1] : vector<256x256xf32> to vector<256xf32>
    %18 = vector.shape_cast %17 : vector<256xf32> to vector<256x1xf32>
    %19 = tpu.reciprocal %18 {approx = true} : vector<256x1xf32> -> vector<256x1xf32>
    %20 = vector.broadcast %19 : vector<256x1xf32> to vector<256x256xf32>
    %21 = arith.mulf %16, %20 : vector<256x256xf32>
    %22 = arith.truncf %9 : vector<16x256xf32> to vector<16x256xbf16>
    %23 = arith.truncf %21 : vector<256x256xf32> to vector<256x256xbf16>
    %cst_9 = arith.constant dense<0.000000e+00> : vector<16x256xf32>
    %24 = tpu.matmul %22, %23, %cst_9 {dimension_numbers = #tpu.dot_dimension_numbers<[1], [1], [0], [0], [0, 0, 1, 0], [], []>} : vector<16x256xbf16>, vector<256x256xbf16>, vector<16x256xf32> -> vector<16x256xf32>
    %c0_10 = arith.constant 0 : index
    %25 = memref.load %arg1[%c0_10] : memref<1xf32, #tpu.memory_space<smem>>
    %26 = vector.broadcast %25 : f32 to vector<16x256xf32>
    %27 = arith.mulf %26, %24 : vector<16x256xf32>
    %28 = arith.addf %27, %1 : vector<16x256xf32>
    %c0_11 = arith.constant 0 : index
    %c0_12 = arith.constant 0 : index
    %c0_13 = arith.constant 0 : index
    %29 = vector.load %arg5[%c0_11, %c0_12, %c0_13] : memref<1x16x256xf32, #tpu.memory_space<vmem>>, vector<1x16x256xf32>
    %30 = vector.shape_cast %29 : vector<1x16x256xf32> to vector<16x256xf32>
    %31 = vector.shape_cast %28 : vector<16x256xf32> to vector<1x16x256xf32>
    tpu.vector_store %arg5[%c0_11, %c0_12, %c0_13], %31 {strides = array<i32>} : memref<1x16x256xf32, #tpu.memory_space<vmem>>, vector<1x16x256xf32>,
    return
  }
  func.func @transform_0(%arg0: i32) -> i32 {
    %c0_i32 = arith.constant 0 : i32
    %c0_i32_0 = arith.constant 0 : i32
    return %c0_i32 : i32
  }
  func.func @transform_1(%arg0: i32) -> (i32, i32, i32) {
    %c0_i32 = arith.constant 0 : i32
    %c0_i32_0 = arith.constant 0 : i32
    %c0_i32_1 = arith.constant 0 : i32
    return %arg0, %c0_i32, %c0_i32_0 : i32, i32, i32
  }
  func.func @transform_2(%arg0: i32) -> (i32, i32) {
    %c0_i32 = arith.constant 0 : i32
    %c0_i32_0 = arith.constant 0 : i32
    %c0_i32_1 = arith.constant 0 : i32
    return %c0_i32, %c0_i32_0 : i32, i32
  }
  func.func @transform_3(%arg0: i32) -> (i32, i32) {
    %c0_i32 = arith.constant 0 : i32
    %c0_i32_0 = arith.constant 0 : i32
    %c0_i32_1 = arith.constant 0 : i32
    return %c0_i32, %c0_i32_0 : i32, i32
  }
  func.func @transform_4(%arg0: i32) -> (i32, i32, i32) {
    %c0_i32 = arith.constant 0 : i32
    %c0_i32_0 = arith.constant 0 : i32
    %c0_i32_1 = arith.constant 0 : i32
    return %arg0, %c0_i32, %c0_i32_0 : i32, i32, i32
  }
}

</mosaic_0001>

<bundles_post_ra>
// kernel: tpu_custom_call.1
= control target key start
LH: loop header
LB: loop body
LE: loop exit
PB: predicated region body
PF: predicated region fallthrough
CT: control target
= control target key end

     0   :  { %s2539_s0 = inlined_call_operand.<no memory space> [shape: f32[1], index: 0, kind: input, shape index: {}]   ;;  %s2540_s1 = inlined_call_operand.vmem [shape: f32[2,16,256], index: 1, kind: input, shape index: {}]   ;;  %s2541_s2 = inlined_call_operand.vmem [shape: f32[32,16], index: 2, kind: input, shape index: {}]   ;;  %s2542_s3 = inlined_call_operand.vmem [shape: f32[32,1], index: 3, kind: input, shape index: {}]   ;;  %s2543_s4 = inlined_call_operand.hbm [shape: f32[2,16,256], index: 4, kind: output, shape index: {}]  }
   0x1   :  { %9 = sst [smem:[#allocation2]] %s2539_s0 }
   0x2   :  { %10 = vsyncpa [#allocation4], 0 }
   0x3   :  { %12 = vsyncpa [#allocation4 + $0x1], 0  ;;  %s1797_s17 = smov 0   ;;  %s1799_s18 = smov 0  }
   0x4   :  { %s1801_s19 = smov 0   ;;  %s1803_s20 = smov 0  }
   0x5 LB: > { %s1818_s0 = sadd.s32 4294967295, %s1762_s20   ;;  %s1403_s21 = sadd.s32 4294967294, %s1762_s20   ;;  %s1762_s20 = sphi %s1803_s20, %s2629_s20   ;;  %s1758_s19 = sphi %s1801_s19, %s2628_s19   ;;  %s1754_s18 = sphi %s1799_s18, %s2627_s18   ;;  %s1750_s17 = sphi %s1797_s17, %s2626_s17  }
   0x6   : > { %s1822_s22 = sadd.s32 1, %s1762_s20   ;;  %s114_s23 = sadd.s32 1, %s1758_s19 }
   0x7   : > { %s111_s24 = ssub.s32 %s1762_s20, %s1822_s22  ;;  %p124_p0 = scmp.ne.s32.totalorder %s1758_s19, %s1754_s18 }
   0x8   : > { %p112_p1 = scmp.eq.s32.totalorder %s111_s24, 0  ;;  %p125_p2 = scmp.eq.s32.totalorder %s1818_s0, 1 }
   0x9   : > { %p130_p3 = scmp.ne.s32.totalorder %s1754_s18, %s1750_s17  ;;  %p131_p4 = scmp.eq.s32.totalorder %s1403_s21, 1 }
   0xa   : > { %s1833_s25 = scalar_select %p112_p1, %s1758_s19, %s114_s23  }
   0xb   : > { %p1835_p5 = por %p125_p2, %p124_p0  ;;  %p1839_p6 = por %p131_p4, %p130_p3 }
   0xc   : > { %p1406_p7 = scmp.ge.s32.totalorder %s1762_s20, 1  ;;  %p166_p8 = scmp.lt.s32.totalorder %s1762_s20, 3 }
   0xe   : > { %p167_p9 = pnand %p1406_p7, %p166_p8 }
  0x10   : > { %170 = sbr.rel (%p167_p9) target bundleno = 1345 (0x541), region = 36 }
  0x17   : > { %p192_p10 = scmp.lt.s32.totalorder %s1818_s0, 1  ;;  %v2544_v0 = vmov 0.0   ;;  %v1765_v1 = vmov 0   ;;  %v205_v2 = vld [vmem:[%s2542_s3] sm:$0xff]  ;;  %v206_v3 = vld [vmem:[%s2542_s3 + $0x8] sm:$0xff]  ;;  %vm229_vm0 = vcmask 130048  }
  0x18   : > { %306 = vmatprep.mubr.f32.mxu0 %v2544_v0  ;;  %1502 = vset.pattern.permute.xlu0 %v1765_v1  ;;  %v201_v10 = vld [vmem:[%s2541_s2] sm:$0xff]  ;;  %v202_v11 = vld [vmem:[%s2541_s2 + $0x8] sm:$0xff]  ;;  %vm492_vm1 = vcmask 1041408   ;;  %vm395_vm2 = vcmask 15360   ;;  %s1313_s5 = sld [smem:[#allocation2]]  ;;  %s189_s6 = sand.u32 1, %s1754_s18  }
  0x19   : > { %s193_s30 = scalar_select %p192_p10, %s1818_s0, 1  ;;  %211 = vperm.xlu0 %1502, %v205_v2   ;;  %563 = vmatprep.mubr.f32.mxu1 %v2544_v0 }
  0x1a   : > { %s1454_s11 = sshll.u32 %s1818_s0, 9  ;;  %s2498_s0 = scalar_lea.sflag [#allocation4], %s189_s6 }
  0x1b   : > { %s1453_s7 = sshll.u32 %s193_s30, 5  ;;  %s2496_s14 = scalar_lea.hbm %s2543_s4, %s1454_s11 }
  0x1c   : > { %s1858_s10 = scalar_lea.vmem %s2540_s1, %s1453_s7  ;;  %s1407_s7 = sshll.u32 %s189_s6, 5 }
  0x1d   : > { %v198_v4 = vld [vmem:[%s1858_s10 + $0x8] sm:$0xff]  ;;  %v200_v5 = vld [vmem:[%s1858_s10 + $0x18] sm:$0xff]  ;;  %v197_v6 = vld [vmem:[%s1858_s10] sm:$0xff]  ;;  %216 = vperm.xlu0 %1502, %v206_v3   ;;  %s191_s8 = scalar_lea.vmem [#allocation3], %s1407_s7  ;;  %s1766_s16 = smov [#allocation3]  }
  0x1e   : > { %v1455_v7 = vpack.c.bf16 %v200_v5, %v198_v4  ;;  %v199_v8 = vld [vmem:[%s1858_s10 + $0x10] sm:$0xff]  ;;  %s1341_s9 = sshll.u32 %s191_s8, 4  ;;  %s1704_s21 = sshll.u32 %s1766_s16, 4  ;;  %s2489_s9 = int_to_ptr.vmem [resolvable:$true] %s1341_s9  ;;  %s1705_s21 = int_to_ptr.vmem [resolvable:$false] %s1704_s21 }
  0x1f   : > { %v1457_v9 = vpack.c.bf16 %v199_v8, %v197_v6  ;;  %s1700_s15 = scalar_lea.vmem %s2489_s9, 512  ;;  %s1706_s23 = scalar_lea.vmem %s1705_s21, 1024 }
  0x20   : > { %1456 = vmatprep.subr.bf16.mxu0 %v1455_v7  ;;  %p1701_p11 = scmp.ne.s32.totalorder %s2489_s9, %s1700_s15  ;;  %p1707_p0 = scmp.lt.s32.totalorder %s2489_s9, %s1705_s21 }
  0x21   : > { %1458 = vmatpush1.bf16.msra.mxu0 %v1457_v9  ;;  %p1708_p1 = scmp.lt.s32.totalorder %s1706_s23, %s1700_s15 }
  0x22   : > { %p1702_p12 = pnand %p1701_p11, %p1835_p5 }
  0x23   : > { %p1709_p2 = por %p1708_p1, %p1707_p0 }
  0x24   : > { %1410 = vmatmul.mubr.msk.f32.vlgmr.msra.gmra.mrb[0].mxu0 %vm229_vm0, %v201_v10  ;;  %p1703_p13 = pneg %p1702_p12 }
  0x25   : > { %312 = vmatprep.mubr.f32.mxu0 %v2544_v0 }
  0x26   : > { %p1710_p3 = pnand %p1709_p2, %p1703_p13 }
  0x28   : > { %1411 = vmatmul.mubr.msk.f32.gmra.mrb[2].mxu0 %vm229_vm0, %v202_v11 }
  0x29   : > { %318 = vmatprep.mubr.f32.mxu0 %v2544_v0 }
  0x98   : > { %v212_v12 = vpop.permute.xlu0 %211 }
  0x9c   : > { %v217_v17 = vpop.permute.xlu0 %216 }
  0xf7   : > { %v308_v13 = vpop.f32.mrb[0].mxu0 }
  0xf8   : > { %v310_v14 = vpop.f32.mrb[1].mxu0  ;;  %v309_v15 = vadd.f32 %v308_v13, %v212_v12 }
  0xf9   : > { %v311_v21 = vadd.f32 %v310_v14, %v212_v12 }
  0xfa   : > { %331 = vxpose.xlu1.b32.start.end [1/1] (short) %v309_v15, 128 }
  0xfb   : > { %v314_v16 = vpop.f32.mrb[2].mxu0 }
  0xfc   : > { %v316_v18 = vpop.f32.mrb[3].mxu0  ;;  %v315_v20 = vadd.f32 %v314_v16, %v217_v17 }
  0xfd   : > { %v317_v19 = vadd.f32 %v316_v18, %v217_v17 }
  0xff   : > { %1414 = vmatprep.subr.msk.mxu1 %vm492_vm1, %v317_v19 }
 0x100   : > { %1415 = vmatpush1.msk.msra.mxu1 %vm492_vm1, %v315_v20 }
 0x137   : > { %363 = vxpose.xlu1.b32.start.end [1/1] (short) %v311_v21, 128 }
 0x155   : > { %1503 = vset.pattern.permute.xlu1 %v1765_v1 }
 0x17a   : > { %v347_v22 = vpop.trf.xlu1 }
 0x17b   : > { %1416 = vmatmul.mubr.msk.f32.vlgmr.msra.gmra.mrb[0].mxu1 %vm395_vm2, %v347_v22 }
 0x17c   : > { %569 = vmatprep.mubr.f32.mxu1 %v2544_v0 }
 0x17e   : > { %v348_v23 = vpop.trf.xlu1 }
 0x17f   : > { %1417 = vmatmul.mubr.msk.f32.gmra.mrb[2].mxu1 %vm395_vm2, %v348_v23 }
 0x180   : > { %575 = vmatprep.mubr.f32.mxu1 %v2544_v0 }
 0x182   : > { %v349_v24 = vpop.trf.xlu1 }
 0x183   : > { %1418 = vmatmul.mubr.msk.f32.gmra.mrb[4].mxu1 %vm395_vm2, %v349_v24 }
 0x184   : > { %581 = vmatprep.mubr.f32.mxu1 %v2544_v0 }
 0x186   : > { %v350_v25 = vpop.trf.xlu1 }
 0x187   : > { %1419 = vmatmul.mubr.msk.f32.gmra.mrb[6].mxu1 %vm395_vm2, %v350_v25 }
 0x188   : > { %587 = vmatprep.mubr.f32.mxu1 %v2544_v0 }
 0x18a   : > { %v351_v26 = vpop.trf.xlu1 }
 0x18b   : > { %1420 = vmatmul.mubr.msk.f32.gmra.mrb[8].mxu1 %vm395_vm2, %v351_v26 }
 0x18c   : > { %593 = vmatprep.mubr.f32.mxu1 %v2544_v0 }
 0x18e   : > { %v352_v27 = vpop.trf.xlu1 }
 0x18f   : > { %1421 = vmatmul.mubr.msk.f32.gmra.mrb[10].mxu1 %vm395_vm2, %v352_v27 }
 0x190   : > { %599 = vmatprep.mubr.f32.mxu1 %v2544_v0 }
 0x192   : > { %v353_v28 = vpop.trf.xlu1 }
 0x193   : > { %1422 = vmatmul.mubr.msk.f32.gmra.mrb[12].mxu1 %vm395_vm2, %v353_v28 }
 0x194   : > { %605 = vmatprep.mubr.f32.mxu1 %v2544_v0 }
 0x196   : > { %v354_v29 = vpop.trf.xlu1 }
 0x197   : > { %1423 = vmatmul.mubr.msk.f32.gmra.mrb[14].mxu1 %vm395_vm2, %v354_v29 }
 0x198   : > { %611 = vmatprep.mubr.f32.mxu1 %v2544_v0 }
 0x19a   : > { %v355_v30 = vpop.trf.xlu1 }
 0x19b   : > { %1424 = vmatmul.mubr.msk.f32.gmra.mrb[16].mxu1 %vm395_vm2, %v355_v30 }
 0x19c   : > { %617 = vmatprep.mubr.f32.mxu1 %v2544_v0 }
 0x19e   : > { %v356_v31 = vpop.trf.xlu1 }
 0x19f   : > { %1425 = vmatmul.mubr.msk.f32.gmra.mrb[18].mxu1 %vm395_vm2, %v356_v31 }
 0x1a0   : > { %623 = vmatprep.mubr.f32.mxu1 %v2544_v0 }
 0x1a2   : > { %v357_v32 = vpop.trf.xlu1 }
 0x1a3   : > { %1426 = vmatmul.mubr.msk.f32.gmra.mrb[20].mxu1 %vm395_vm2, %v357_v32 }
 0x1a4   : > { %629 = vmatprep.mubr.f32.mxu1 %v2544_v0 }
 0x1a6   : > { %v358_v33 = vpop.trf.xlu1 }
 0x1a7   : > { %1427 = vmatmul.mubr.msk.f32.gmra.mrb[22].mxu1 %vm395_vm2, %v358_v33 }
 0x1a8   : > { %635 = vmatprep.mubr.f32.mxu1 %v2544_v0 }
 0x1aa   : > { %v359_v34 = vpop.trf.xlu1 }
 0x1ab   : > { %1428 = vmatmul.mubr.msk.f32.gmra.mrb[24].mxu1 %vm395_vm2, %v359_v34 }
 0x1ac   : > { %641 = vmatprep.mubr.f32.mxu1 %v2544_v0 }
 0x1ae   : > { %v360_v35 = vpop.trf.xlu1 }
 0x1af   : > { %1429 = vmatmul.mubr.msk.f32.gmra.mrb[26].mxu1 %vm395_vm2, %v360_v35 }
 0x1b0   : > { %647 = vmatprep.mubr.f32.mxu1 %v2544_v0 }
 0x1b2   : > { %v361_v36 = vpop.trf.xlu1 }
 0x1b3   : > { %1430 = vmatmul.mubr.msk.f32.gmra.mrb[28].mxu1 %vm395_vm2, %v361_v36 }
 0x1b4   : > { %653 = vmatprep.mubr.f32.mxu1 %v2544_v0 }
 0x1b6   : > { %v362_v37 = vpop.trf.xlu1 }
 0x1b7   : > { %1431 = vmatmul.mubr.msk.f32.gmra.mrb[30].mxu1 %vm395_vm2, %v362_v37 }
 0x1b8   : > { %659 = vmatprep.mubr.f32.mxu1 %v2544_v0 }
 0x1ba   : > { %v379_v38 = vpop.trf.xlu1 }
 0x1bb   : > { %1432 = vmatmul.mubr.msk.f32.gmra.mrb[32].mxu1 %vm395_vm2, %v379_v38 }
 0x1bc   : > { %665 = vmatprep.mubr.f32.mxu1 %v2544_v0 }
 0x1be   : > { %v380_v39 = vpop.trf.xlu1 }
 0x1bf   : > { %1433 = vmatmul.mubr.msk.f32.gmra.mrb[34].mxu1 %vm395_vm2, %v380_v39 }
 0x1c0   : > { %671 = vmatprep.mubr.f32.mxu1 %v2544_v0 }
 0x1c2   : > { %v381_v40 = vpop.trf.xlu1 }
 0x1c3   : > { %1434 = vmatmul.mubr.msk.f32.gmra.mrb[36].mxu1 %vm395_vm2, %v381_v40 }
 0x1c4   : > { %677 = vmatprep.mubr.f32.mxu1 %v2544_v0 }
 0x1c6   : > { %v382_v41 = vpop.trf.xlu1 }
 0x1c7   : > { %1435 = vmatmul.mubr.msk.f32.gmra.mrb[38].mxu1 %vm395_vm2, %v382_v41 }
 0x1c8   : > { %683 = vmatprep.mubr.f32.mxu1 %v2544_v0 }
 0x1ca   : > { %v383_v42 = vpop.trf.xlu1 }
 0x1cb   : > { %1436 = vmatmul.mubr.msk.f32.gmra.mrb[40].mxu1 %vm395_vm2, %v383_v42 }
 0x1cc   : > { %689 = vmatprep.mubr.f32.mxu1 %v2544_v0 }
 0x1ce   : > { %v384_v43 = vpop.trf.xlu1 }
 0x1cf   : > { %1437 = vmatmul.mubr.msk.f32.gmra.mrb[42].mxu1 %vm395_vm2, %v384_v43 }
 0x1d0   : > { %695 = vmatprep.mubr.f32.mxu1 %v2544_v0 }
 0x1d2   : > { %v385_v44 = vpop.trf.xlu1 }
 0x1d3   : > { %1438 = vmatmul.mubr.msk.f32.gmra.mrb[44].mxu1 %vm395_vm2, %v385_v44 }
 0x1d4   : > { %701 = vmatprep.mubr.f32.mxu1 %v2544_v0 }
 0x1d6   : > { %v386_v45 = vpop.trf.xlu1 }
 0x1d7   : > { %1439 = vmatmul.mubr.msk.f32.gmra.mrb[46].mxu1 %vm395_vm2, %v386_v45 }
 0x1d8   : > { %707 = vmatprep.mubr.f32.mxu1 %v2544_v0 }
 0x1da   : > { %v387_v46 = vpop.trf.xlu1 }
 0x1db   : > { %1440 = vmatmul.mubr.msk.f32.gmra.mrb[48].mxu1 %vm395_vm2, %v387_v46 }
 0x1dc   : > { %713 = vmatprep.mubr.f32.mxu1 %v2544_v0 }
 0x1de   : > { %v388_v47 = vpop.trf.xlu1 }
 0x1df   : > { %1441 = vmatmul.mubr.msk.f32.gmra.mrb[50].mxu1 %vm395_vm2, %v388_v47 }
 0x1e0   : > { %719 = vmatprep.mubr.f32.mxu1 %v2544_v0 }
 0x1e2   : > { %v389_v48 = vpop.trf.xlu1 }
 0x1e3   : > { %1442 = vmatmul.mubr.msk.f32.gmra.mrb[52].mxu1 %vm395_vm2, %v389_v48 }
 0x1e4   : > { %725 = vmatprep.mubr.f32.mxu1 %v2544_v0 }
 0x1e6   : > { %v390_v49 = vpop.trf.xlu1 }
 0x1e7   : > { %1443 = vmatmul.mubr.msk.f32.gmra.mrb[54].mxu1 %vm395_vm2, %v390_v49 }
 0x1e8   : > { %731 = vmatprep.mubr.f32.mxu1 %v2544_v0 }
 0x1ea   : > { %v391_v50 = vpop.trf.xlu1 }
 0x1eb   : > { %1444 = vmatmul.mubr.msk.f32.gmra.mrb[56].mxu1 %vm395_vm2, %v391_v50 }
 0x1ec   : > { %737 = vmatprep.mubr.f32.mxu1 %v2544_v0 }
 0x1ee   : > { %v392_v51 = vpop.trf.xlu1 }
 0x1ef   : > { %1445 = vmatmul.mubr.msk.f32.gmra.mrb[58].mxu1 %vm395_vm2, %v392_v51 }
 0x1f0   : > { %743 = vmatprep.mubr.f32.mxu1 %v2544_v0 }
 0x1f2   : > { %v393_v52 = vpop.trf.xlu1 }
 0x1f3   : > { %1446 = vmatmul.mubr.msk.f32.gmra.mrb[60].mxu1 %vm395_vm2, %v393_v52 }
 0x1f4   : > { %749 = vmatprep.mubr.f32.mxu1 %v2544_v0 }
 0x1f6   : > { %v394_v53 = vpop.trf.xlu1 }
 0x1f7   : > { %1447 = vmatmul.mubr.msk.f32.gmra.mrb[62].mxu1 %vm395_vm2, %v394_v53 }
 0x24e   : > { %v1937_v54 = vpop.f32.mrb[0].mxu1 }
 0x24f   : > { %v1939_v55 = vpop.f32.mrb[1].mxu1 }
 0x250   : > { %v756_v56 = vmax.f32 %v1937_v54, %v1939_v55 }
 0x252   : > { %757 = vmax.xlane.f32.xlu0 %v756_v56  ;;  %v1943_v57 = vpop.f32.mrb[2].mxu1 }
 0x253   : > { %v1945_v58 = vpop.f32.mrb[3].mxu1 }
 0x254   : > { %v759_v59 = vmax.f32 %v1943_v57, %v1945_v58 }
 0x256   : > { %760 = vmax.xlane.f32.xlu0 %v759_v59  ;;  %v1949_v60 = vpop.f32.mrb[4].mxu1 }
 0x257   : > { %v1951_v61 = vpop.f32.mrb[5].mxu1 }
 0x258   : > { %v762_v62 = vmax.f32 %v1949_v60, %v1951_v61 }
 0x25a   : > { %763 = vmax.xlane.f32.xlu0 %v762_v62  ;;  %v1955_v63 = vpop.f32.mrb[6].mxu1 }
 0x25b   : > { %v1957_v1 = vpop.f32.mrb[7].mxu1 }
 0x25c   : > { %v765_v2 = vmax.f32 %v1955_v63, %v1957_v1 }
 0x25e   : > { %766 = vmax.xlane.f32.xlu0 %v765_v2  ;;  %v1961_v3 = vpop.f32.mrb[8].mxu1 }
 0x25f   : > { %v1963_v4 = vpop.f32.mrb[9].mxu1 }
 0x260   : > { %v768_v5 = vmax.f32 %v1961_v3, %v1963_v4 }
 0x262   : > { %769 = vmax.xlane.f32.xlu0 %v768_v5  ;;  %v1967_v6 = vpop.f32.mrb[10].mxu1 }
 0x263   : > { %v1969_v7 = vpop.f32.mrb[11].mxu1 }
 0x264   : > { %v771_v8 = vmax.f32 %v1967_v6, %v1969_v7 }
 0x266   : > { %772 = vmax.xlane.f32.xlu0 %v771_v8  ;;  %v1973_v9 = vpop.f32.mrb[12].mxu1 }
 0x267   : > { %v1975_v10 = vpop.f32.mrb[13].mxu1 }
 0x268   : > { %v774_v11 = vmax.f32 %v1973_v9, %v1975_v10 }
 0x26a   : > { %775 = vmax.xlane.f32.xlu0 %v774_v11  ;;  %v1979_v12 = vpop.f32.mrb[14].mxu1 }
 0x26b   : > { %v1981_v13 = vpop.f32.mrb[15].mxu1 }
 0x26c   : > { %v777_v14 = vmax.f32 %v1979_v12, %v1981_v13 }
 0x26e   : > { %778 = vmax.xlane.f32.xlu0 %v777_v14  ;;  %v1985_v15 = vpop.f32.mrb[16].mxu1 }
 0x26f   : > { %v1987_v16 = vpop.f32.mrb[17].mxu1 }
 0x270   : > { %v780_v17 = vmax.f32 %v1985_v15, %v1987_v16 }
 0x272   : > { %781 = vmax.xlane.f32.xlu1 %v780_v17  ;;  %v1991_v18 = vpop.f32.mrb[18].mxu1 }
 0x273   : > { %v1993_v19 = vpop.f32.mrb[19].mxu1 }
 0x274   : > { %v783_v20 = vmax.f32 %v1991_v18, %v1993_v19 }
 0x276   : > { %784 = vmax.xlane.f32.xlu0 %v783_v20  ;;  %v1997_v21 = vpop.f32.mrb[20].mxu1 }
 0x277   : > { %v1999_v22 = vpop.f32.mrb[21].mxu1 }
 0x278   : > { %v786_v23 = vmax.f32 %v1997_v21, %v1999_v22 }
 0x27a   : > { %787 = vmax.xlane.f32.xlu0 %v786_v23  ;;  %v2003_v24 = vpop.f32.mrb[22].mxu1 }
 0x27b   : > { %v2005_v25 = vpop.f32.mrb[23].mxu1 }
 0x27c   : > { %v789_v26 = vmax.f32 %v2003_v24, %v2005_v25 }
 0x27e   : > { %790 = vmax.xlane.f32.xlu0 %v789_v26  ;;  %v2009_v27 = vpop.f32.mrb[24].mxu1 }
 0x27f   : > { %v2011_v28 = vpop.f32.mrb[25].mxu1 }
 0x280   : > { %v792_v29 = vmax.f32 %v2009_v27, %v2011_v28 }
 0x282   : > { %793 = vmax.xlane.f32.xlu0 %v792_v29  ;;  %v2015_v30 = vpop.f32.mrb[26].mxu1 }
 0x283   : > { %v2017_v31 = vpop.f32.mrb[27].mxu1 }
 0x284   : > { %v795_v32 = vmax.f32 %v2015_v30, %v2017_v31 }
 0x286   : > { %796 = vmax.xlane.f32.xlu0 %v795_v32  ;;  %v2021_v33 = vpop.f32.mrb[28].mxu1 }
 0x287   : > { %v2023_v34 = vpop.f32.mrb[29].mxu1 }
 0x288   : > { %v798_v35 = vmax.f32 %v2021_v33, %v2023_v34 }
 0x28a   : > { %799 = vmax.xlane.f32.xlu0 %v798_v35  ;;  %v2027_v36 = vpop.f32.mrb[30].mxu1 }
 0x28b   : > { %v2029_v37 = vpop.f32.mrb[31].mxu1 }
 0x28c   : > { %v801_v38 = vmax.f32 %v2027_v36, %v2029_v37 }
 0x28e   : > { %802 = vmax.xlane.f32.xlu0 %v801_v38  ;;  %v2033_v39 = vpop.f32.mrb[32].mxu1 }
 0x28f   : > { %v2035_v40 = vpop.f32.mrb[33].mxu1 }
 0x290   : > { %v804_v41 = vmax.f32 %v2033_v39, %v2035_v40 }
 0x292   : > { %805 = vmax.xlane.f32.xlu0 %v804_v41  ;;  %v2039_v42 = vpop.f32.mrb[34].mxu1 }
 0x293   : > { %v2041_v43 = vpop.f32.mrb[35].mxu1 }
 0x294   : > { %v807_v44 = vmax.f32 %v2039_v42, %v2041_v43 }
 0x296   : > { %808 = vmax.xlane.f32.xlu0 %v807_v44  ;;  %v2045_v45 = vpop.f32.mrb[36].mxu1 }
 0x297   : > { %v2047_v46 = vpop.f32.mrb[37].mxu1 }
 0x298   : > { %v810_v47 = vmax.f32 %v2045_v45, %v2047_v46 }
 0x29a   : > { %811 = vmax.xlane.f32.xlu0 %v810_v47  ;;  %v2051_v48 = vpop.f32.mrb[38].mxu1 }
 0x29b   : > { %v2053_v49 = vpop.f32.mrb[39].mxu1 }
 0x29c   : > { %v813_v50 = vmax.f32 %v2051_v48, %v2053_v49 }
 0x29e   : > { %814 = vmax.xlane.f32.xlu0 %v813_v50  ;;  %v2057_v51 = vpop.f32.mrb[40].mxu1 }
 0x29f   : > { %v2059_v52 = vpop.f32.mrb[41].mxu1 }
 0x2a0   : > { %v816_v53 = vmax.f32 %v2057_v51, %v2059_v52 }
 0x2a2   : > { %817 = vmax.xlane.f32.xlu0 %v816_v53  ;;  %v2063_v56 = vpop.f32.mrb[42].mxu1 }
 0x2a3   : > { %v2065_v59 = vpop.f32.mrb[43].mxu1 }
 0x2a4   : > { %v819_v62 = vmax.f32 %v2063_v56, %v2065_v59 }
 0x2a6   : > { %820 = vmax.xlane.f32.xlu0 %v819_v62  ;;  %v2069_v2 = vpop.f32.mrb[44].mxu1 }
 0x2a7   : > { %v2071_v5 = vpop.f32.mrb[45].mxu1 }
 0x2a8   : > { %v822_v8 = vmax.f32 %v2069_v2, %v2071_v5 }
 0x2aa   : > { %823 = vmax.xlane.f32.xlu0 %v822_v8  ;;  %v2075_v11 = vpop.f32.mrb[46].mxu1 }
 0x2ab   : > { %v2077_v14 = vpop.f32.mrb[47].mxu1 }
 0x2ac   : > { %v825_v17 = vmax.f32 %v2075_v11, %v2077_v14 }
 0x2ae   : > { %826 = vmax.xlane.f32.xlu0 %v825_v17  ;;  %v2081_v20 = vpop.f32.mrb[48].mxu1 }
 0x2af   : > { %2572 = vst [vmem:[#allocation6_spill] sm:$0xff] %v2081_v20  ;;  %v2083_v23 = vpop.f32.mrb[49].mxu1 }
 0x2b0   : > { %2573 = vst [vmem:[#allocation7_spill] sm:$0xff] %v2083_v23  ;;  %v828_v26 = vmax.f32 %v2081_v20, %v2083_v23 }
 0x2b2   : > { %829 = vmax.xlane.f32.xlu0 %v828_v26  ;;  %v2087_v29 = vpop.f32.mrb[50].mxu1 }
 0x2b3   : > { %2574 = vst [vmem:[#allocation8_spill] sm:$0xff] %v2087_v29  ;;  %v2089_v32 = vpop.f32.mrb[51].mxu1 }
 0x2b4   : > { %2575 = vst [vmem:[#allocation9_spill] sm:$0xff] %v2089_v32  ;;  %v831_v35 = vmax.f32 %v2087_v29, %v2089_v32  ;;  %v203_v29 = vld [vmem:[%s2541_s2 + $0x10] sm:$0xff] }
 0x2b5   : > { %1412 = vmatmul.mubr.msk.f32.gmra.mrb[4].mxu0 %vm229_vm0, %v203_v29 }
 0x2b6   : > { %832 = vmax.xlane.f32.xlu0 %v831_v35  ;;  %v2093_v38 = vpop.f32.mrb[52].mxu1 }
 0x2b7   : > { %2576 = vst [vmem:[#allocation10_spill] sm:$0xff] %v2093_v38  ;;  %v2095_v41 = vpop.f32.mrb[53].mxu1 }
 0x2b8   : > { %2577 = vst [vmem:[#allocation11_spill] sm:$0xff] %v2095_v41  ;;  %v834_v44 = vmax.f32 %v2093_v38, %v2095_v41 }
 0x2ba   : > { %835 = vmax.xlane.f32.xlu0 %v834_v44  ;;  %v2099_v47 = vpop.f32.mrb[54].mxu1 }
 0x2bb   : > { %2578 = vst [vmem:[#allocation12_spill] sm:$0xff] %v2099_v47  ;;  %v2101_v50 = vpop.f32.mrb[55].mxu1 }
 0x2bc   : > { %2579 = vst [vmem:[#allocation13_spill] sm:$0xff] %v2101_v50  ;;  %v837_v53 = vmax.f32 %v2099_v47, %v2101_v50 }
 0x2be   : > { %838 = vmax.xlane.f32.xlu0 %v837_v53  ;;  %v2105_v62 = vpop.f32.mrb[56].mxu1 }
 0x2bf   : > { %2580 = vst [vmem:[#allocation14_spill] sm:$0xff] %v2105_v62  ;;  %v2107_v8 = vpop.f32.mrb[57].mxu1 }
 0x2c0   : > { %2581 = vst [vmem:[#allocation15_spill] sm:$0xff] %v2107_v8  ;;  %v840_v17 = vmax.f32 %v2105_v62, %v2107_v8 }
 0x2c2   : > { %841 = vmax.xlane.f32.xlu1 %v840_v17  ;;  %v2111_v26 = vpop.f32.mrb[58].mxu1  ;;  %v2582_v17 = vmov 0.0  }
 0x2c3   : > { %v2113_v35 = vpop.f32.mrb[59].mxu1  ;;  %324 = vmatprep.mubr.f32.mxu0 %v2582_v17 }
 0x2c6   : > { %v2117_v0 = vpop.f32.mrb[60].mxu1 }
 0x2c7   : > { %v2119_v41 = vpop.f32.mrb[61].mxu1 }
 0x2ca   : > { %v2123_v50 = vpop.f32.mrb[62].mxu1 }
 0x2cb   : > { %v2125_v47 = vpop.f32.mrb[63].mxu1 }
 0x2df   : > { %v758_v8 = vpop.xlane.xlu0 %757 }
 0x2e0   : > { %v852_v62 = vsub.f32 %v1937_v54, %v758_v8  ;;  %v853_v38 = vsub.f32 %v1939_v55, %v758_v8  ;;  %v204_v54 = vld [vmem:[%s2541_s2 + $0x18] sm:$0xff] }
 0x2e1   : > { %1413 = vmatmul.mubr.msk.f32.gmra.mrb[6].mxu0 %vm229_vm0, %v204_v54 }
 0x2e2   : > { %v916_v44 = vmul.f32 1.442695, %v852_v62  ;;  %v918_v32 = vmul.f32 1.442695, %v853_v38 }
 0x2e3   : > { %v761_v23 = vpop.xlane.xlu0 %760 }
 0x2e4   : > { %1504 = vpow2.f32 %v916_v44  ;;  %v854_v53 = vsub.f32 %v1943_v57, %v761_v23  ;;  %v855_v20 = vsub.f32 %v1945_v58, %v761_v23 }
 0x2e5   : > { %1506 = vpow2.f32 %v918_v32 }
 0x2e6   : > { %v920_v55 = vmul.f32 1.442695, %v854_v53  ;;  %v922_v38 = vmul.f32 1.442695, %v855_v20 }
 0x2e7   : > { %v764_v62 = vpop.xlane.xlu0 %763 }
 0x2e8   : > { %1508 = vpow2.f32 %v920_v55  ;;  %v856_v29 = vsub.f32 %v1949_v60, %v764_v62  ;;  %v857_v8 = vsub.f32 %v1951_v61, %v764_v62 }
 0x2e9   : > { %1510 = vpow2.f32 %v922_v38 }
 0x2ea   : > { %v924_v57 = vmul.f32 1.442695, %v856_v29  ;;  %v926_v58 = vmul.f32 1.442695, %v857_v8 }
 0x2eb   : > { %v767_v23 = vpop.xlane.xlu0 %766 }
 0x2ec   : > { %1512 = vpow2.f32 %v924_v57  ;;  %v858_v44 = vsub.f32 %v1955_v63, %v767_v23  ;;  %v859_v17 = vsub.f32 %v1957_v1, %v767_v23 }
 0x2ed   : > { %1514 = vpow2.f32 %v926_v58 }
 0x2ee   : > { %v2146_v32 = vpop.eup %1504  ;;  %v928_v20 = vmul.f32 1.442695, %v858_v44  ;;  %v930_v53 = vmul.f32 1.442695, %v859_v17 }
 0x2ef   : > { %v2148_v54 = vpop.eup %1506  ;;  %v770_v55 = vpop.xlane.xlu0 %769 }
 0x2f0   : > { %1516 = vpow2.f32 %v928_v20  ;;  %v860_v60 = vsub.f32 %v1961_v3, %v770_v55  ;;  %v861_v61 = vsub.f32 %v1963_v4, %v770_v55  ;;  %v1044_v38 = vadd.f32 %v2148_v54, %v2146_v32 }
 0x2f1   : > { %1518 = vpow2.f32 %v930_v53 }
 0x2f2   : > { %v2154_v63 = vpop.eup %1508  ;;  %v932_v1 = vmul.f32 1.442695, %v860_v60  ;;  %v934_v62 = vmul.f32 1.442695, %v861_v61  ;;  %1045 = vadd.xlane.f32.xlu0 %v1044_v38 }
 0x2f3   : > { %v2156_v29 = vpop.eup %1510  ;;  %v773_v8 = vpop.xlane.xlu0 %772 }
 0x2f4   : > { %1520 = vpow2.f32 %v932_v1  ;;  %v862_v57 = vsub.f32 %v1967_v6, %v773_v8  ;;  %v863_v58 = vsub.f32 %v1969_v7, %v773_v8  ;;  %v1047_v3 = vadd.f32 %v2156_v29, %v2154_v63 }
 0x2f5   : > { %1522 = vpow2.f32 %v934_v62 }
 0x2f6   : > { %v2162_v4 = vpop.eup %1512  ;;  %v936_v23 = vmul.f32 1.442695, %v862_v57  ;;  %v938_v44 = vmul.f32 1.442695, %v863_v58  ;;  %1048 = vadd.xlane.f32.xlu0 %v1047_v3 }
 0x2f7   : > { %v2164_v17 = vpop.eup %1514  ;;  %v776_v20 = vpop.xlane.xlu0 %775 }
 0x2f8   : > { %1524 = vpow2.f32 %v936_v23  ;;  %v864_v53 = vsub.f32 %v1973_v9, %v776_v20  ;;  %v865_v55 = vsub.f32 %v1975_v10, %v776_v20  ;;  %v1050_v6 = vadd.f32 %v2164_v17, %v2162_v4 }
 0x2f9   : > { %1526 = vpow2.f32 %v938_v44 }
 0x2fa   : > { %v2170_v7 = vpop.eup %1516  ;;  %v940_v60 = vmul.f32 1.442695, %v864_v53  ;;  %v942_v61 = vmul.f32 1.442695, %v865_v55  ;;  %1051 = vadd.xlane.f32.xlu0 %v1050_v6 }
 0x2fb   : > { %v2172_v38 = vpop.eup %1518  ;;  %v779_v1 = vpop.xlane.xlu0 %778 }
 0x2fc   : > { %1528 = vpow2.f32 %v940_v60  ;;  %v866_v62 = vsub.f32 %v1979_v12, %v779_v1  ;;  %v867_v8 = vsub.f32 %v1981_v13, %v779_v1  ;;  %v1053_v9 = vadd.f32 %v2172_v38, %v2170_v7 }
 0x2fd   : > { %1530 = vpow2.f32 %v942_v61 }
 0x2fe   : > { %v2178_v10 = vpop.eup %1520  ;;  %v944_v57 = vmul.f32 1.442695, %v866_v62  ;;  %v946_v58 = vmul.f32 1.442695, %v867_v8  ;;  %1054 = vadd.xlane.f32.xlu0 %v1053_v9 }
 0x2ff   : > { %v2180_v3 = vpop.eup %1522  ;;  %v782_v23 = vpop.xlane.xlu1 %781 }
 0x300   : > { %1532 = vpow2.f32 %v944_v57  ;;  %v868_v44 = vsub.f32 %v1985_v15, %v782_v23  ;;  %v869_v20 = vsub.f32 %v1987_v16, %v782_v23  ;;  %v1056_v12 = vadd.f32 %v2180_v3, %v2178_v10 }
 0x301   : > { %1534 = vpow2.f32 %v946_v58 }
 0x302   : > { %v2186_v13 = vpop.eup %1524  ;;  %v948_v53 = vmul.f32 1.442695, %v868_v44  ;;  %v950_v55 = vmul.f32 1.442695, %v869_v20  ;;  %1057 = vadd.xlane.f32.xlu0 %v1056_v12  ;;  %v2583_v12 = vmax.f32 %v2111_v26, %v2113_v35 }
 0x303   : > { %v2188_v6 = vpop.eup %1526  ;;  %v785_v60 = vpop.xlane.xlu0 %784 }
 0x304   : > { %1536 = vpow2.f32 %v948_v53  ;;  %v870_v61 = vsub.f32 %v1991_v18, %v785_v60  ;;  %v871_v1 = vsub.f32 %v1993_v19, %v785_v60  ;;  %v1059_v15 = vadd.f32 %v2188_v6, %v2186_v13 }
 0x305   : > { %1538 = vpow2.f32 %v950_v55 }
 0x306   : > { %v2194_v16 = vpop.eup %1528  ;;  %v952_v62 = vmul.f32 1.442695, %v870_v61  ;;  %v954_v8 = vmul.f32 1.442695, %v871_v1  ;;  %1060 = vadd.xlane.f32.xlu0 %v1059_v15 }
 0x307   : > { %v2196_v9 = vpop.eup %1530  ;;  %v788_v57 = vpop.xlane.xlu0 %787 }
 0x308   : > { %1540 = vpow2.f32 %v952_v62  ;;  %v872_v58 = vsub.f32 %v1997_v21, %v788_v57  ;;  %v873_v23 = vsub.f32 %v1999_v22, %v788_v57  ;;  %v1062_v18 = vadd.f32 %v2196_v9, %v2194_v16 }
 0x309   : > { %1542 = vpow2.f32 %v954_v8  ;;  %v2584_v62 = vmax.f32 %v2117_v0, %v2119_v41 }
 0x30a   : > { %v2202_v19 = vpop.eup %1532  ;;  %v956_v44 = vmul.f32 1.442695, %v872_v58  ;;  %v958_v20 = vmul.f32 1.442695, %v873_v23  ;;  %1063 = vadd.xlane.f32.xlu1 %v1062_v18  ;;  %844 = vmax.xlane.f32.xlu0 %v2583_v12 }
 0x30b   : > { %v2207_v53 = vpop.eup %1534  ;;  %v791_v55 = vpop.xlane.xlu0 %790 }
 0x30c   : > { %1544 = vpow2.f32 %v956_v44  ;;  %v874_v21 = vsub.f32 %v2003_v24, %v791_v55  ;;  %v875_v22 = vsub.f32 %v2005_v25, %v791_v55  ;;  %v1065_v60 = vadd.f32 %v2207_v53, %v2202_v19 }
 0x30d   : > { %1546 = vpow2.f32 %v958_v20  ;;  %v2585_v20 = vmax.f32 %v2123_v50, %v2125_v47 }
 0x30e   : > { %v2213_v61 = vpop.eup %1536  ;;  %v960_v1 = vmul.f32 1.442695, %v874_v21  ;;  %v962_v15 = vmul.f32 1.442695, %v875_v22  ;;  %1066 = vadd.xlane.f32.xlu0 %v1065_v60  ;;  %847 = vmax.xlane.f32.xlu1 %v2584_v62 }
 0x30f   : > { %v2218_v8 = vpop.eup %1538  ;;  %v794_v57 = vpop.xlane.xlu0 %793 }
 0x310   : > { %1548 = vpow2.f32 %v960_v1  ;;  %v876_v24 = vsub.f32 %v2009_v27, %v794_v57  ;;  %v877_v25 = vsub.f32 %v2011_v28, %v794_v57  ;;  %v1068_v58 = vadd.f32 %v2218_v8, %v2213_v61 }
 0x311   : > { %1550 = vpow2.f32 %v962_v15 }
 0x312   : > { %v2224_v23 = vpop.eup %1540  ;;  %v964_v18 = vmul.f32 1.442695, %v876_v24  ;;  %v966_v44 = vmul.f32 1.442695, %v877_v25  ;;  %850 = vmax.xlane.f32.xlu0 %v2585_v20  ;;  %1069 = vadd.xlane.f32.xlu1 %v1068_v58 }
 0x313   : > { %v2229_v12 = vpop.eup %1542  ;;  %v797_v55 = vpop.xlane.xlu0 %796 }
 0x314   : > { %1552 = vpow2.f32 %v964_v18  ;;  %v878_v27 = vsub.f32 %v2015_v30, %v797_v55  ;;  %v879_v28 = vsub.f32 %v2017_v31, %v797_v55  ;;  %v1071_v21 = vadd.f32 %v2229_v12, %v2224_v23 }
 0x315   : > { %1554 = vpow2.f32 %v966_v44 }
 0x316   : > { %v2235_v22 = vpop.eup %1544  ;;  %v968_v60 = vmul.f32 1.442695, %v878_v27  ;;  %v970_v1 = vmul.f32 1.442695, %v879_v28  ;;  %1072 = vadd.xlane.f32.xlu0 %v1071_v21 }
 0x317   : > { %v2237_v15 = vpop.eup %1546  ;;  %v800_v62 = vpop.xlane.xlu0 %799 }
 0x318   : > { %1556 = vpow2.f32 %v968_v60  ;;  %v880_v57 = vsub.f32 %v2021_v33, %v800_v62  ;;  %v881_v24 = vsub.f32 %v2023_v34, %v800_v62  ;;  %v1074_v30 = vadd.f32 %v2237_v15, %v2235_v22 }
 0x319   : > { %1558 = vpow2.f32 %v970_v1 }
 0x31a   : > { %v2243_v31 = vpop.eup %1548  ;;  %v972_v25 = vmul.f32 1.442695, %v880_v57  ;;  %v974_v58 = vmul.f32 1.442695, %v881_v24  ;;  %1075 = vadd.xlane.f32.xlu1 %v1074_v30 }
 0x31b   : > { %v2245_v18 = vpop.eup %1550  ;;  %v803_v44 = vpop.xlane.xlu0 %802 }
 0x31c   : > { %1560 = vpow2.f32 %v972_v25  ;;  %v882_v20 = vsub.f32 %v2027_v36, %v803_v44  ;;  %v883_v55 = vsub.f32 %v2029_v37, %v803_v44  ;;  %v1077_v33 = vadd.f32 %v2245_v18, %v2243_v31 }
 0x31d   : > { %1562 = vpow2.f32 %v974_v58 }
 0x31e   : > { %v2251_v34 = vpop.eup %1552  ;;  %v976_v27 = vmul.f32 1.442695, %v882_v20  ;;  %v978_v28 = vmul.f32 1.442695, %v883_v55  ;;  %1078 = vadd.xlane.f32.xlu0 %v1077_v33 }
 0x31f   : > { %v2253_v21 = vpop.eup %1554  ;;  %v806_v60 = vpop.xlane.xlu0 %805 }
 0x320   : > { %1564 = vpow2.f32 %v976_v27  ;;  %v884_v1 = vsub.f32 %v2033_v39, %v806_v60  ;;  %v885_v62 = vsub.f32 %v2035_v40, %v806_v60  ;;  %v1080_v36 = vadd.f32 %v2253_v21, %v2251_v34 }
 0x321   : > { %1566 = vpow2.f32 %v978_v28 }
 0x322   : > { %v2259_v37 = vpop.eup %1556  ;;  %v980_v57 = vmul.f32 1.442695, %v884_v1  ;;  %v982_v24 = vmul.f32 1.442695, %v885_v62  ;;  %1081 = vadd.xlane.f32.xlu1 %v1080_v36 }
 0x323   : > { %v2261_v30 = vpop.eup %1558  ;;  %v809_v25 = vpop.xlane.xlu0 %808 }
 0x324   : > { %1568 = vpow2.f32 %v980_v57  ;;  %v886_v58 = vsub.f32 %v2039_v42, %v809_v25  ;;  %v887_v44 = vsub.f32 %v2041_v43, %v809_v25  ;;  %v1083_v39 = vadd.f32 %v2261_v30, %v2259_v37 }
 0x325   : > { %1570 = vpow2.f32 %v982_v24 }
 0x326   : > { %v2267_v40 = vpop.eup %1560  ;;  %v984_v20 = vmul.f32 1.442695, %v886_v58  ;;  %v986_v55 = vmul.f32 1.442695, %v887_v44  ;;  %1084 = vadd.xlane.f32.xlu0 %v1083_v39 }
 0x327   : > { %v2269_v33 = vpop.eup %1562  ;;  %v812_v27 = vpop.xlane.xlu0 %811 }
 0x328   : > { %1572 = vpow2.f32 %v984_v20  ;;  %v888_v28 = vsub.f32 %v2045_v45, %v812_v27  ;;  %v889_v60 = vsub.f32 %v2047_v46, %v812_v27  ;;  %v1086_v42 = vadd.f32 %v2269_v33, %v2267_v40 }
 0x329   : > { %1574 = vpow2.f32 %v986_v55 }
 0x32a   : > { %v2275_v43 = vpop.eup %1564  ;;  %v988_v1 = vmul.f32 1.442695, %v888_v28  ;;  %v990_v62 = vmul.f32 1.442695, %v889_v60  ;;  %1087 = vadd.xlane.f32.xlu1 %v1086_v42 }
 0x32b   : > { %v2277_v36 = vpop.eup %1566  ;;  %v815_v57 = vpop.xlane.xlu0 %814 }
 0x32c   : > { %1576 = vpow2.f32 %v988_v1  ;;  %v890_v24 = vsub.f32 %v2051_v48, %v815_v57  ;;  %v891_v25 = vsub.f32 %v2053_v49, %v815_v57  ;;  %v1089_v45 = vadd.f32 %v2277_v36, %v2275_v43 }
 0x32d   : > { %1578 = vpow2.f32 %v990_v62 }
 0x32e   : > { %v2283_v46 = vpop.eup %1568  ;;  %v992_v58 = vmul.f32 1.442695, %v890_v24  ;;  %v994_v44 = vmul.f32 1.442695, %v891_v25  ;;  %1090 = vadd.xlane.f32.xlu0 %v1089_v45 }
 0x32f   : > { %v2285_v39 = vpop.eup %1570  ;;  %v818_v20 = vpop.xlane.xlu0 %817 }
 0x330   : > { %1580 = vpow2.f32 %v992_v58  ;;  %v892_v55 = vsub.f32 %v2057_v51, %v818_v20  ;;  %v893_v27 = vsub.f32 %v2059_v52, %v818_v20  ;;  %v1092_v48 = vadd.f32 %v2285_v39, %v2283_v46 }
 0x331   : > { %1582 = vpow2.f32 %v994_v44 }
 0x332   : > { %v2291_v49 = vpop.eup %1572  ;;  %v996_v28 = vmul.f32 1.442695, %v892_v55  ;;  %v998_v60 = vmul.f32 1.442695, %v893_v27  ;;  %1093 = vadd.xlane.f32.xlu1 %v1092_v48 }
 0x333   : > { %v2293_v42 = vpop.eup %1574  ;;  %v821_v1 = vpop.xlane.xlu0 %820 }
 0x334   : > { %1584 = vpow2.f32 %v996_v28  ;;  %v894_v62 = vsub.f32 %v2063_v56, %v821_v1  ;;  %v895_v57 = vsub.f32 %v2065_v59, %v821_v1  ;;  %v1095_v51 = vadd.f32 %v2293_v42, %v2291_v49 }
 0x335   : > { %1586 = vpow2.f32 %v998_v60 }
 0x336   : > { %v2299_v52 = vpop.eup %1576  ;;  %v1000_v24 = vmul.f32 1.442695, %v894_v62  ;;  %v1002_v25 = vmul.f32 1.442695, %v895_v57  ;;  %1096 = vadd.xlane.f32.xlu0 %v1095_v51 }
 0x337   : > { %v2301_v45 = vpop.eup %1578  ;;  %v824_v58 = vpop.xlane.xlu0 %823 }
 0x338   : > { %1588 = vpow2.f32 %v1000_v24  ;;  %v896_v44 = vsub.f32 %v2069_v2, %v824_v58  ;;  %v897_v20 = vsub.f32 %v2071_v5, %v824_v58  ;;  %v1098_v56 = vadd.f32 %v2301_v45, %v2299_v52 }
 0x339   : > { %1590 = vpow2.f32 %v1002_v25  ;;  %v2588_v25 = vld [vmem:[#allocation6_spill] sm:$0xff] }
 0x33a   : > { %v2307_v59 = vpop.eup %1580  ;;  %v1004_v55 = vmul.f32 1.442695, %v896_v44  ;;  %v1006_v27 = vmul.f32 1.442695, %v897_v20  ;;  %1099 = vadd.xlane.f32.xlu1 %v1098_v56  ;;  %v2589_v44 = vld [vmem:[#allocation7_spill] sm:$0xff] }
 0x33b   : > { %v2309_v48 = vpop.eup %1582  ;;  %v827_v28 = vpop.xlane.xlu0 %826 }
 0x33c   : > { %1592 = vpow2.f32 %v1004_v55  ;;  %v898_v60 = vsub.f32 %v2075_v11, %v827_v28  ;;  %v899_v1 = vsub.f32 %v2077_v14, %v827_v28  ;;  %v1101_v2 = vadd.f32 %v2309_v48, %v2307_v59 }
 0x33d   : > { %1594 = vpow2.f32 %v1006_v27 }
 0x33e   : > { %v2315_v5 = vpop.eup %1584  ;;  %v1008_v62 = vmul.f32 1.442695, %v898_v60  ;;  %v1010_v57 = vmul.f32 1.442695, %v899_v1  ;;  %1102 = vadd.xlane.f32.xlu0 %v1101_v2  ;;  %v2592_v60 = vld [vmem:[#allocation8_spill] sm:$0xff]  ;;  %v2593_v2 = vld [vmem:[#allocation9_spill] sm:$0xff] }
 0x33f   : > { %2586 = vst [vmem:[#allocation16_spill] sm:$0xff] %v2315_v5  ;;  %v2317_v51 = vpop.eup %1586  ;;  %v830_v24 = vpop.xlane.xlu0 %829 }
 0x340   : > { %2587 = vst [vmem:[#allocation17_spill] sm:$0xff] %v2317_v51  ;;  %1596 = vpow2.f32 %v1008_v62  ;;  %v900_v58 = vsub.f32 %v2588_v25, %v830_v24  ;;  %v901_v20 = vsub.f32 %v2589_v44, %v830_v24  ;;  %v1104_v11 = vadd.f32 %v2317_v51, %v2315_v5 }
 0x341   : > { %1598 = vpow2.f32 %v1010_v57 }
 0x342   : > { %v2323_v14 = vpop.eup %1588  ;;  %v1012_v56 = vmul.f32 1.442695, %v900_v58  ;;  %v1014_v55 = vmul.f32 1.442695, %v901_v20  ;;  %1105 = vadd.xlane.f32.xlu1 %v1104_v11  ;;  %v2596_v11 = vld [vmem:[#allocation10_spill] sm:$0xff] }
 0x343   : > { %2590 = vst [vmem:[#allocation6_spill] sm:$0xff] %v2323_v14  ;;  %v2325_v27 = vpop.eup %1590  ;;  %v833_v28 = vpop.xlane.xlu0 %832 }
 0x344   : > { %2591 = vst [vmem:[#allocation7_spill] sm:$0xff] %v2325_v27  ;;  %1600 = vpow2.f32 %v1012_v56  ;;  %v902_v1 = vsub.f32 %v2592_v60, %v833_v28  ;;  %v903_v62 = vsub.f32 %v2593_v2, %v833_v28  ;;  %v1107_v24 = vadd.f32 %v2325_v27, %v2323_v14  ;;  %v2597_v56 = vld [vmem:[#allocation11_spill] sm:$0xff] }
 0x345   : > { %1602 = vpow2.f32 %v1014_v55 }
 0x346   : > { %v2331_v25 = vpop.eup %1592  ;;  %v1016_v57 = vmul.f32 1.442695, %v902_v1  ;;  %v1018_v44 = vmul.f32 1.442695, %v903_v62  ;;  %1108 = vadd.xlane.f32.xlu0 %v1107_v24  ;;  %v2598_v24 = vld [vmem:[#allocation12_spill] sm:$0xff] }
 0x347   : > { %2594 = vst [vmem:[#allocation8_spill] sm:$0xff] %v2331_v25  ;;  %v2333_v58 = vpop.eup %1594  ;;  %v836_v20 = vpop.xlane.xlu0 %835 }
 0x348   : > { %2595 = vst [vmem:[#allocation9_spill] sm:$0xff] %v2333_v58  ;;  %1604 = vpow2.f32 %v1016_v57  ;;  %v904_v5 = vsub.f32 %v2596_v11, %v836_v20  ;;  %v905_v51 = vsub.f32 %v2597_v56, %v836_v20  ;;  %v1110_v28 = vadd.f32 %v2333_v58, %v2331_v25  ;;  %v2599_v57 = vld [vmem:[#allocation13_spill] sm:$0xff] }
 0x349   : > { %1606 = vpow2.f32 %v1018_v44 }
 0x34a   : > { %v2339_v60 = vpop.eup %1596  ;;  %v1020_v55 = vmul.f32 1.442695, %v904_v5  ;;  %v1022_v2 = vmul.f32 1.442695, %v905_v51  ;;  %1111 = vadd.xlane.f32.xlu1 %v1110_v28  ;;  %v2601_v28 = vld [vmem:[#allocation14_spill] sm:$0xff] }
 0x34b   : > { %v2341_v1 = vpop.eup %1598  ;;  %v839_v62 = vpop.xlane.xlu0 %838 }
 0x34c   : > { %1608 = vpow2.f32 %v1020_v55  ;;  %v906_v14 = vsub.f32 %v2598_v24, %v839_v62  ;;  %v907_v27 = vsub.f32 %v2599_v57, %v839_v62  ;;  %v1113_v20 = vadd.f32 %v2341_v1, %v2339_v60  ;;  %v2602_v55 = vld [vmem:[#allocation15_spill] sm:$0xff] }
 0x34d   : > { %1610 = vpow2.f32 %v1022_v2 }
 0x34e   : > { %v2347_v11 = vpop.eup %1600  ;;  %v1024_v44 = vmul.f32 1.442695, %v906_v14  ;;  %v1026_v56 = vmul.f32 1.442695, %v907_v27  ;;  %1114 = vadd.xlane.f32.xlu0 %v1113_v20 }
 0x34f   : > { %2600 = vst [vmem:[#allocation10_spill] sm:$0xff] %v2347_v11  ;;  %v2349_v5 = vpop.eup %1602  ;;  %v842_v51 = vpop.xlane.xlu1 %841 }
 0x350   : > { %1612 = vpow2.f32 %v1024_v44  ;;  %v908_v25 = vsub.f32 %v2601_v28, %v842_v51  ;;  %v909_v58 = vsub.f32 %v2602_v55, %v842_v51  ;;  %v1116_v62 = vadd.f32 %v2349_v5, %v2347_v11 }
 0x351   : > { %1614 = vpow2.f32 %v1026_v56 }
 0x352   : > { %v2355_v24 = vpop.eup %1604  ;;  %v1028_v2 = vmul.f32 1.442695, %v908_v25  ;;  %v1030_v57 = vmul.f32 1.442695, %v909_v58  ;;  %1117 = vadd.xlane.f32.xlu1 %v1116_v62 }
 0x353   : > { %2603 = vst [vmem:[#allocation11_spill] sm:$0xff] %v2355_v24  ;;  %v2357_v14 = vpop.eup %1606 }
 0x354   : > { %2604 = vst [vmem:[#allocation12_spill] sm:$0xff] %v2357_v14  ;;  %1616 = vpow2.f32 %v1028_v2  ;;  %v1119_v27 = vadd.f32 %v2357_v14, %v2355_v24 }
 0x355   : > { %1618 = vpow2.f32 %v1030_v57 }
 0x356   : > { %v2361_v20 = vpop.eup %1608  ;;  %1120 = vadd.xlane.f32.xlu0 %v1119_v27 }
 0x357   : > { %2605 = vst [vmem:[#allocation13_spill] sm:$0xff] %v2361_v20  ;;  %v2363_v44 = vpop.eup %1610 }
 0x358   : > { %2606 = vst [vmem:[#allocation14_spill] sm:$0xff] %v2363_v44  ;;  %v1122_v56 = vadd.f32 %v2363_v44, %v2361_v20 }
 0x35a   : > { %v2367_v51 = vpop.eup %1612  ;;  %1123 = vadd.xlane.f32.xlu1 %v1122_v56 }
 0x35b   : > { %2607 = vst [vmem:[#allocation15_spill] sm:$0xff] %v2367_v51  ;;  %v2369_v25 = vpop.eup %1614 }
 0x35c   : > { %2608 = vst [vmem:[#allocation18_spill] sm:$0xff] %v2369_v25  ;;  %v1125_v58 = vadd.f32 %v2369_v25, %v2367_v51 }
 0x35e   : > { %v2373_v28 = vpop.eup %1616  ;;  %1126 = vadd.xlane.f32.xlu0 %v1125_v58 }
 0x35f   : > { %2609 = vst [vmem:[#allocation19_spill] sm:$0xff] %v2373_v28  ;;  %v2375_v55 = vpop.eup %1618 }
 0x360   : > { %2610 = vst [vmem:[#allocation20_spill] sm:$0xff] %v2375_v55  ;;  %v1128_v62 = vadd.f32 %v2375_v55, %v2373_v28 }
 0x362   : > { %1129 = vadd.xlane.f32.xlu1 %v1128_v62 }
 0x37f   : > { %v1046_v2 = vpop.xlane.xlu0 %1045 }
 0x380   : > { %1620 = vrcp.f32 %v1046_v2 }
 0x383   : > { %v1049_v57 = vpop.xlane.xlu0 %1048 }
 0x384   : > { %1622 = vrcp.f32 %v1049_v57 }
 0x387   : > { %v1052_v27 = vpop.xlane.xlu0 %1051 }
 0x388   : > { %1624 = vrcp.f32 %v1052_v27 }
 0x38a   : > { %v1621_v20 = vpop.eup %1620 }
 0x38b   : > { %v1055_v56 = vpop.xlane.xlu0 %1054  ;;  %v1173_v25 = vmul.f32 %v1621_v20, %v2148_v54  ;;  %v1172_v11 = vmul.f32 %v1621_v20, %v2146_v32 }
 0x38c   : > { %1626 = vrcp.f32 %v1055_v56 }
 0x38e   : > { %v1623_v44 = vpop.eup %1622 }
 0x38f   : > { %v1058_v51 = vpop.xlane.xlu0 %1057  ;;  %v1175_v58 = vmul.f32 %v1623_v44, %v2156_v29  ;;  %v1174_v28 = vmul.f32 %v1623_v44, %v2154_v63 }
 0x390   : > { %1628 = vrcp.f32 %v1058_v51 }
 0x391   : > { %v1239_v62 = vpack.c.bf16 %v1175_v58, %v1173_v25  ;;  %v1238_v55 = vpack.c.bf16 %v1174_v28, %v1172_v11 }
 0x392   : > { %v1625_v57 = vpop.eup %1624 }
 0x393   : > { %1270 = vmatprep.subr.bf16.mxu1 %v1239_v62  ;;  %v1061_v2 = vpop.xlane.xlu0 %1060  ;;  %v1177_v14 = vmul.f32 %v1625_v57, %v2164_v17  ;;  %v1176_v29 = vmul.f32 %v1625_v57, %v2162_v4 }
 0x394   : > { %1630 = vrcp.f32 %v1061_v2  ;;  %1271 = vmatpush1.bf16.xpose.msra.mxu1 %v1238_v55 }
 0x396   : > { %v1627_v27 = vpop.eup %1626 }
 0x397   : > { %v845_v56 = vpop.xlane.xlu0 %844  ;;  %v1064_v24 = vpop.xlane.xlu1 %1063  ;;  %v1179_v54 = vmul.f32 %v1627_v27, %v2172_v38  ;;  %v1178_v32 = vmul.f32 %v1627_v27, %v2170_v7 }
 0x398   : > { %v910_v63 = vsub.f32 %v2111_v26, %v845_v56  ;;  %v911_v11 = vsub.f32 %v2113_v35, %v845_v56  ;;  %1632 = vrcp.f32 %v1064_v24 }
 0x399   : > { %v1241_v20 = vpack.c.bf16 %v1179_v54, %v1177_v14  ;;  %v1240_v44 = vpack.c.bf16 %v1178_v32, %v1176_v29 }
 0x39a   : > { %v1032_v51 = vmul.f32 1.442695, %v910_v63  ;;  %v1034_v25 = vmul.f32 1.442695, %v911_v11  ;;  %v1629_v58 = vpop.eup %1628 }
 0x39b   : > { %1272 = vmatprep.subr.bf16.mxu1 %v1241_v20  ;;  %v1067_v28 = vpop.xlane.xlu0 %1066  ;;  %v848_v55 = vpop.xlane.xlu1 %847  ;;  %v1181_v14 = vmul.f32 %v1629_v58, %v2180_v3  ;;  %v1180_v62 = vmul.f32 %v1629_v58, %v2178_v10 }
 0x39c   : > { %1634 = vpow2.f32 %v1032_v51  ;;  %v912_v17 = vsub.f32 %v2117_v0, %v848_v55  ;;  %v913_v4 = vsub.f32 %v2119_v41, %v848_v55  ;;  %1273 = vmatpush1.bf16.xpose.msra.mxu1 %v1240_v44 }
 0x39d   : > { %1636 = vpow2.f32 %v1034_v25 }
 0x39e   : > { %v1631_v7 = vpop.eup %1630  ;;  %1638 = vrcp.f32 %v1067_v28  ;;  %v1036_v26 = vmul.f32 1.442695, %v912_v17  ;;  %v1038_v35 = vmul.f32 1.442695, %v913_v4 }
 0x39f   : > { %v851_v38 = vpop.xlane.xlu0 %850  ;;  %v1183_v24 = vmul.f32 %v1631_v7, %v2188_v6  ;;  %v1182_v2 = vmul.f32 %v1631_v7, %v2186_v13  ;;  %v1070_v57 = vpop.xlane.xlu1 %1069 }
 0x3a0   : > { %1640 = vpow2.f32 %v1036_v26  ;;  %v914_v0 = vsub.f32 %v2123_v50, %v851_v38  ;;  %v915_v41 = vsub.f32 %v2125_v47, %v851_v38 }
 0x3a1   : > { %1642 = vpow2.f32 %v1038_v35  ;;  %v1243_v27 = vpack.c.bf16 %v1183_v24, %v1181_v14  ;;  %v1242_v56 = vpack.c.bf16 %v1182_v2, %v1180_v62 }
 0x3a2   : > { %v1040_v54 = vmul.f32 1.442695, %v914_v0  ;;  %v1042_v29 = vmul.f32 1.442695, %v915_v41  ;;  %1644 = vrcp.f32 %v1070_v57  ;;  %v1633_v6 = vpop.eup %1632 }
 0x3a3   : > { %1274 = vmatprep.subr.bf16.mxu1 %v1243_v27  ;;  %v1073_v3 = vpop.xlane.xlu0 %1072  ;;  %v1185_v63 = vmul.f32 %v1633_v6, %v2196_v9  ;;  %v1184_v20 = vmul.f32 %v1633_v6, %v2194_v16 }
 0x3a4   : > { %1646 = vpow2.f32 %v1040_v54  ;;  %1275 = vmatpush1.bf16.xpose.msra.mxu1 %v1242_v56 }
 0x3a5   : > { %1648 = vpow2.f32 %v1042_v29 }
 0x3a6   : > { %v2397_v10 = vpop.eup %1634  ;;  %1650 = vrcp.f32 %v1073_v3  ;;  %v207_v3 = vld [vmem:[%s2542_s3 + $0x10] sm:$0xff] }
 0x3a7   : > { %v2399_v13 = vpop.eup %1636  ;;  %v1076_v50 = vpop.xlane.xlu1 %1075 }
 0x3a8   : > { %v1639_v47 = vpop.eup %1638  ;;  %v1131_v32 = vadd.f32 %v2399_v13, %v2397_v10  ;;  %1652 = vrcp.f32 %v1076_v50 }
 0x3a9   : > { %v1187_v11 = vmul.f32 %v1639_v47, %v2207_v53  ;;  %v1186_v44 = vmul.f32 %v1639_v47, %v2202_v19  ;;  %v2434_v47 = vpop.f32.mrb[4].mxu0 }
 0x3aa   : > { %v2407_v51 = vpop.eup %1640  ;;  %1132 = vadd.xlane.f32.xlu0 %v1131_v32 }
 0x3ab   : > { %v2409_v25 = vpop.eup %1642  ;;  %v1079_v28 = vpop.xlane.xlu0 %1078  ;;  %v1245_v55 = vpack.c.bf16 %v1187_v11, %v1185_v63  ;;  %v1244_v58 = vpack.c.bf16 %v1186_v44, %v1184_v20 }
 0x3ac   : > { %1654 = vrcp.f32 %v1079_v28  ;;  %v1134_v17 = vadd.f32 %v2409_v25, %v2407_v51  ;;  %v1645_v9 = vpop.eup %1644  ;;  %v2436_v63 = vpop.f32.mrb[5].mxu0 }
 0x3ad   : > { %1276 = vmatprep.subr.bf16.mxu1 %v1245_v55  ;;  %v1189_v26 = vmul.f32 %v1645_v9, %v2218_v8  ;;  %v1188_v38 = vmul.f32 %v1645_v9, %v2213_v61 }
 0x3ae   : > { %v2413_v53 = vpop.eup %1646  ;;  %1277 = vmatpush1.bf16.xpose.msra.mxu1 %v1244_v58  ;;  %1135 = vadd.xlane.f32.xlu1 %v1134_v17 }
 0x3af   : > { %v2415_v16 = vpop.eup %1648  ;;  %v1082_v19 = vpop.xlane.xlu1 %1081 }
 0x3b0   : > { %v1651_v4 = vpop.eup %1650  ;;  %v1137_v7 = vadd.f32 %v2415_v16, %v2413_v53  ;;  %1656 = vrcp.f32 %v1082_v19 }
 0x3b1   : > { %v1191_v35 = vmul.f32 %v1651_v4, %v2229_v12  ;;  %v1190_v14 = vmul.f32 %v1651_v4, %v2224_v23 }
 0x3b2   : > { %1138 = vadd.xlane.f32.xlu0 %v1137_v7  ;;  %v1653_v0 = vpop.eup %1652 }
 0x3b3   : > { %v1085_v24 = vpop.xlane.xlu0 %1084  ;;  %v1247_v62 = vpack.c.bf16 %v1191_v35, %v1189_v26  ;;  %v1246_v2 = vpack.c.bf16 %v1190_v14, %v1188_v38  ;;  %v1193_v27 = vmul.f32 %v1653_v0, %v2237_v15  ;;  %v1192_v61 = vmul.f32 %v1653_v0, %v2235_v22 }
 0x3b4   : > { %1658 = vrcp.f32 %v1085_v24  ;;  %v2438_v20 = vpop.f32.mrb[6].mxu0 }
 0x3b5   : > { %1278 = vmatprep.subr.bf16.mxu1 %v1247_v62  ;;  %v2440_v28 = vpop.f32.mrb[7].mxu0 }
 0x3b6   : > { %v1655_v41 = vpop.eup %1654  ;;  %1279 = vmatpush1.bf16.xpose.msra.mxu1 %v1246_v2 }
 0x3b7   : > { %v1088_v57 = vpop.xlane.xlu1 %1087  ;;  %v1195_v8 = vmul.f32 %v1655_v41, %v2245_v18  ;;  %v1194_v12 = vmul.f32 %v1655_v41, %v2243_v31 }
 0x3b8   : > { %1660 = vrcp.f32 %v1088_v57 }
 0x3b9   : > { %v1249_v23 = vpack.c.bf16 %v1195_v8, %v1193_v27  ;;  %v1248_v56 = vpack.c.bf16 %v1194_v12, %v1192_v61 }
 0x3ba   : > { %v1657_v29 = vpop.eup %1656 }
 0x3bb   : > { %v1091_v54 = vpop.xlane.xlu0 %1090  ;;  %1280 = vmatprep.subr.bf16.mxu1 %v1249_v23  ;;  %v1197_v18 = vmul.f32 %v1657_v29, %v2253_v21  ;;  %v1196_v50 = vmul.f32 %v1657_v29, %v2251_v34  ;;  %v2612_v29 = vld [vmem:[#allocation7_spill] sm:$0xff] }
 0x3bc   : > { %1662 = vrcp.f32 %v1091_v54 }
 0x3be   : > { %v1659_v6 = vpop.eup %1658  ;;  %1281 = vmatpush1.bf16.xpose.msra.mxu1 %v1248_v56  ;;  %v2611_v56 = vld [vmem:[#allocation17_spill] sm:$0xff] }
 0x3bf   : > { %v1094_v15 = vpop.xlane.xlu1 %1093  ;;  %v1199_v31 = vmul.f32 %v1659_v6, %v2261_v30  ;;  %v1198_v22 = vmul.f32 %v1659_v6, %v2259_v37  ;;  %221 = vperm.xlu1 %1503, %v207_v3   ;;  %v208_v37 = vld [vmem:[%s2542_s3 + $0x18] sm:$0xff]  ;;  %v2613_v3 = vld [vmem:[#allocation6_spill] sm:$0xff]  ;;  %v2614_v6 = vld [vmem:[#allocation16_spill] sm:$0xff] }
 0x3c0   : > { %1664 = vrcp.f32 %v1094_v15 }
 0x3c1   : > { %v1251_v32 = vpack.c.bf16 %v1199_v31, %v1197_v18  ;;  %v1250_v11 = vpack.c.bf16 %v1198_v22, %v1196_v50 }
 0x3c2   : > { %v1661_v21 = vpop.eup %1660 }
 0x3c3   : > { %v1097_v44 = vpop.xlane.xlu0 %1096  ;;  %1282 = vmatprep.subr.bf16.mxu1 %v1251_v32  ;;  %v1201_v55 = vmul.f32 %v1661_v21, %v2269_v33  ;;  %v1200_v9 = vmul.f32 %v1661_v21, %v2267_v40  ;;  %v2615_v32 = vld [vmem:[#allocation9_spill] sm:$0xff] }
 0x3c4   : > { %1666 = vrcp.f32 %v1097_v44 }
 0x3c6   : > { %v1663_v34 = vpop.eup %1662  ;;  %1283 = vmatpush1.bf16.xpose.msra.mxu1 %v1250_v11 }
 0x3c7   : > { %v1100_v30 = vpop.xlane.xlu1 %1099  ;;  %v1203_v58 = vmul.f32 %v1663_v34, %v2277_v36  ;;  %v1202_v17 = vmul.f32 %v1663_v34, %v2275_v43 }
 0x3c8   : > { %226 = vperm.xlu0 %1502, %v208_v37   ;;  %1668 = vrcp.f32 %v1100_v30  ;;  %v2616_v37 = vld [vmem:[#allocation8_spill] sm:$0xff] }
 0x3c9   : > { %v1253_v19 = vpack.c.bf16 %v1203_v58, %v1201_v55  ;;  %v1252_v4 = vpack.c.bf16 %v1202_v17, %v1200_v9 }
 0x3ca   : > { %v1665_v26 = vpop.eup %1664 }
 0x3cb   : > { %v1103_v7 = vpop.xlane.xlu0 %1102  ;;  %1284 = vmatprep.subr.bf16.mxu1 %v1253_v19  ;;  %v1205_v14 = vmul.f32 %v1665_v26, %v2285_v39  ;;  %v1204_v43 = vmul.f32 %v1665_v26, %v2283_v46  ;;  %v2618_v26 = vld [vmem:[#allocation11_spill] sm:$0xff] }
 0x3cc   : > { %1670 = vrcp.f32 %v1103_v7 }
 0x3ce   : > { %v1667_v35 = vpop.eup %1666  ;;  %1285 = vmatpush1.bf16.xpose.msra.mxu1 %v1252_v4  ;;  %v2617_v4 = vld [vmem:[#allocation12_spill] sm:$0xff] }
 0x3cf   : > { %v1106_v38 = vpop.xlane.xlu1 %1105  ;;  %v1207_v33 = vmul.f32 %v1667_v35, %v2293_v42  ;;  %v1206_v36 = vmul.f32 %v1667_v35, %v2291_v49 }
 0x3d0   : > { %1672 = vrcp.f32 %v1106_v38 }
 0x3d1   : > { %v1255_v24 = vpack.c.bf16 %v1207_v33, %v1205_v14  ;;  %v1254_v40 = vpack.c.bf16 %v1206_v36, %v1204_v43  ;;  %v2620_v43 = vld [vmem:[#allocation14_spill] sm:$0xff] }
 0x3d2   : > { %v1669_v2 = vpop.eup %1668 }
 0x3d3   : > { %v1109_v62 = vpop.xlane.xlu0 %1108  ;;  %1286 = vmatprep.subr.bf16.mxu1 %v1255_v24  ;;  %v1209_v57 = vmul.f32 %v1669_v2, %v2301_v45  ;;  %v1208_v49 = vmul.f32 %v1669_v2, %v2299_v52  ;;  %v2622_v2 = vld [vmem:[#allocation15_spill] sm:$0xff] }
 0x3d4   : > { %1674 = vrcp.f32 %v1109_v62 }
 0x3d6   : > { %v1671_v0 = vpop.eup %1670  ;;  %1287 = vmatpush1.bf16.xpose.msra.mxu1 %v1254_v40  ;;  %v2621_v40 = vld [vmem:[#allocation18_spill] sm:$0xff] }
 0x3d7   : > { %v1112_v41 = vpop.xlane.xlu1 %1111  ;;  %v1211_v39 = vmul.f32 %v1671_v0, %v2309_v48  ;;  %v1210_v42 = vmul.f32 %v1671_v0, %v2307_v59 }
 0x3d8   : > { %1676 = vrcp.f32 %v1112_v41  ;;  %v2623_v41 = vld [vmem:[#allocation13_spill] sm:$0xff] }
 0x3d9   : > { %v1257_v27 = vpack.c.bf16 %v1211_v39, %v1209_v57  ;;  %v1256_v46 = vpack.c.bf16 %v1210_v42, %v1208_v49 }
 0x3da   : > { %v1673_v12 = vpop.eup %1672 }
 0x3db   : > { %v1115_v8 = vpop.xlane.xlu0 %1114  ;;  %1288 = vmatprep.subr.bf16.mxu1 %v1257_v27  ;;  %v1213_v54 = vmul.f32 %v1673_v12, %v2611_v56  ;;  %v1212_v59 = vmul.f32 %v1673_v12, %v2614_v6 }
 0x3dc   : > { %1678 = vrcp.f32 %v1115_v8 }
 0x3de   : > { %v1675_v61 = vpop.eup %1674  ;;  %1289 = vmatpush1.bf16.xpose.msra.mxu1 %v1256_v46 }
 0x3df   : > { %v1118_v23 = vpop.xlane.xlu1 %1117  ;;  %v1215_v45 = vmul.f32 %v1675_v61, %v2612_v29  ;;  %v1214_v48 = vmul.f32 %v1675_v61, %v2613_v3  ;;  %v2624_v61 = vld [vmem:[#allocation20_spill] sm:$0xff]  ;;  %v2625_v29 = vld [vmem:[#allocation19_spill] sm:$0xff] }
 0x3e0   : > { %1680 = vrcp.f32 %v1118_v23 }
 0x3e1   : > { %v1259_v15 = vpack.c.bf16 %v1215_v45, %v1213_v54  ;;  %v1258_v52 = vpack.c.bf16 %v1214_v48, %v1212_v59 }
 0x3e2   : > { %v1677_v31 = vpop.eup %1676 }
 0x3e3   : > { %v1121_v18 = vpop.xlane.xlu0 %1120  ;;  %1290 = vmatprep.subr.bf16.mxu1 %v1259_v15  ;;  %v1217_v11 = vmul.f32 %v1677_v31, %v2615_v32  ;;  %v1216_v34 = vmul.f32 %v1677_v31, %v2616_v37  ;;  %v1696_v37 = vld [vmem:[%s1858_s10] sm:$0xff] }
 0x3e4   : > { %1682 = vrcp.f32 %v1121_v18 }
 0x3e6   : > { %v1679_v22 = vpop.eup %1678  ;;  %1291 = vmatpush1.bf16.xpose.msra.mxu1 %v1258_v52 }
 0x3e7   : > { %v1124_v50 = vpop.xlane.xlu1 %1123  ;;  %v1219_v44 = vmul.f32 %v1679_v22, %v2341_v1  ;;  %v1218_v21 = vmul.f32 %v1679_v22, %v2339_v60  ;;  %v2619_v1 = vld [vmem:[#allocation10_spill] sm:$0xff] }
 0x3e8   : > { %1684 = vrcp.f32 %v1124_v50 }
 0x3e9   : > { %v1261_v30 = vpack.c.bf16 %v1219_v44, %v1217_v11  ;;  %v1260_v55 = vpack.c.bf16 %v1218_v21, %v1216_v34 }
 0x3ea   : > { %v1681_v17 = vpop.eup %1680 }
 0x3eb   : > { %v1127_v58 = vpop.xlane.xlu0 %1126  ;;  %1292 = vmatprep.subr.bf16.mxu1 %v1261_v30  ;;  %v1221_v19 = vmul.f32 %v1681_v17, %v2349_v5  ;;  %v1220_v38 = vmul.f32 %v1681_v17, %v2619_v1 }
 0x3ec   : > { %1686 = vrcp.f32 %v1127_v58  ;;  %v1697_v58 = vld [vmem:[%s1858_s10 + $0x8] sm:$0xff] }
 0x3ee   : > { %v1683_v9 = vpop.eup %1682  ;;  %1293 = vmatpush1.bf16.xpose.msra.mxu1 %v1260_v55 }
 0x3ef   : > { %v1223_v7 = vmul.f32 %v1683_v9, %v2617_v4  ;;  %v1222_v35 = vmul.f32 %v1683_v9, %v2618_v26  ;;  %v1130_v42 = vpop.xlane.xlu1 %1129 }
 0x3f0   : > { %1688 = vrcp.f32 %v1130_v42 }
 0x3f1   : > { %v1263_v60 = vpack.c.bf16 %v1223_v7, %v1221_v19  ;;  %v1262_v14 = vpack.c.bf16 %v1222_v35, %v1220_v38  ;;  %v1698_v19 = vld [vmem:[%s1858_s10 + $0x10] sm:$0xff]  ;;  %v1699_v7 = vld [vmem:[%s1858_s10 + $0x18] sm:$0xff] }
 0x3f2   : > { %v1685_v33 = vpop.eup %1684 }
 0x3f3   : > { %1294 = vmatprep.subr.bf16.mxu1 %v1263_v60  ;;  %v1225_v24 = vmul.f32 %v1685_v33, %v2620_v43  ;;  %v1224_v5 = vmul.f32 %v1685_v33, %v2623_v41 }
 0x3f6   : > { %v1687_v36 = vpop.eup %1686  ;;  %1295 = vmatpush1.bf16.xpose.msra.mxu1 %v1262_v14 }
 0x3f7   : > { %v1227_v62 = vmul.f32 %v1687_v36, %v2621_v40  ;;  %v1226_v0 = vmul.f32 %v1687_v36, %v2622_v2 }
 0x3f9   : > { %v1265_v57 = vpack.c.bf16 %v1227_v62, %v1225_v24  ;;  %v1264_v39 = vpack.c.bf16 %v1226_v0, %v1224_v5 }
 0x3fa   : > { %v1689_v8 = vpop.eup %1688 }
 0x3fb   : > { %1296 = vmatprep.subr.bf16.mxu1 %v1265_v57  ;;  %v1229_v23 = vmul.f32 %v1689_v8, %v2624_v61  ;;  %v1228_v45 = vmul.f32 %v1689_v8, %v2625_v29 }
 0x3fe   : > { %1297 = vmatpush1.bf16.xpose.msra.mxu1 %v1264_v39 }
 0x437   : > { %v1133_v49 = vpop.xlane.xlu0 %1132 }
 0x438   : > { %1690 = vrcp.f32 %v1133_v49 }
 0x43b   : > { %v1136_v27 = vpop.xlane.xlu1 %1135 }
 0x43c   : > { %1692 = vrcp.f32 %v1136_v27 }
 0x43f   : > { %v1139_v46 = vpop.xlane.xlu0 %1138  ;;  %v222_v54 = vpop.permute.xlu1 %221 }
 0x440   : > { %1694 = vrcp.f32 %v1139_v46  ;;  %v321_v59 = vadd.f32 %v2434_v47, %v222_v54  ;;  %v323_v15 = vadd.f32 %v2436_v63, %v222_v54 }
 0x442   : > { %v1691_v12 = vpop.eup %1690 }
 0x443   : > { %v1231_v56 = vmul.f32 %v1691_v12, %v2399_v13  ;;  %v1230_v3 = vmul.f32 %v1691_v12, %v2397_v10 }
 0x445   : > { %v1267_v48 = vpack.c.bf16 %v1231_v56, %v1229_v23  ;;  %v1266_v6 = vpack.c.bf16 %v1230_v3, %v1228_v45 }
 0x446   : > { %v1693_v18 = vpop.eup %1692 }
 0x447   : > { %v227_v52 = vpop.permute.xlu0 %226  ;;  %1298 = vmatprep.subr.bf16.mxu1 %v1267_v48  ;;  %v1233_v10 = vmul.f32 %v1693_v18, %v2409_v25  ;;  %v1232_v47 = vmul.f32 %v1693_v18, %v2407_v51 }
 0x448   : > { %v327_v31 = vadd.f32 %v2438_v20, %v227_v52  ;;  %v329_v22 = vadd.f32 %v2440_v28, %v227_v52  ;;  %1299 = vmatpush1.bf16.xpose.msra.mxu1 %v1266_v6  ;;  %v1314_v20 = vstv %s1313_s5 }
 0x44a   : > { %v1695_v13 = vpop.eup %1694  ;;  %v1236_v50 = vpack.c.bf16 %v327_v31, %v321_v59  ;;  %v1237_v32 = vpack.c.bf16 %v329_v22, %v323_v15 }
 0x44b   : > { %v1235_v11 = vmul.f32 %v1695_v13, %v2415_v16  ;;  %v1234_v63 = vmul.f32 %v1695_v13, %v2413_v53 }
 0x44c   : > { %1302 = vmatprep.mubr.bf16.mxu1 %v1237_v32 }
 0x44d   : > { %v1269_v44 = vpack.c.bf16 %v1235_v11, %v1233_v10  ;;  %v1268_v21 = vpack.c.bf16 %v1234_v63, %v1232_v47 }
 0x44f   : > { %1300 = vmatprep.subr.bf16.mxu1 %v1269_v44 }
 0x450   : > { %1301 = vmatpush1.bf16.xpose.msra.mxu1 %v1268_v21 }
 0x457   : > { %1303 = vmatmul.mubr.bf16.vlgmr.msra.gmra.mrb[64].mxu1 %v1236_v50 }
 0x52a   : > { %v1304_v25 = vpop.f32.mrb[64].mxu1 }
 0x52b   : > { %v1315_v28 = vmul.f32 %v1314_v20, %v1304_v25  ;;  %v1306_v16 = vpop.f32.mrb[65].mxu1 }
 0x52c   : > { %v1316_v51 = vmul.f32 %v1314_v20, %v1306_v16  ;;  %v1308_v53 = vpop.f32.mrb[66].mxu1 }
 0x52d   : > { %v1319_v34 = vadd.f32 %v1696_v37, %v1315_v28  ;;  %v1317_v30 = vmul.f32 %v1314_v20, %v1308_v53  ;;  %v1310_v55 = vpop.f32.mrb[67].mxu1 }
 0x52e   : > { %v1320_v17 = vadd.f32 %v1697_v58, %v1316_v51  ;;  %v1318_v9 = vmul.f32 %v1314_v20, %v1310_v55 }
 0x52f   : > { %1323 = vst [vmem:[%s191_s8] sm:$0xff] %v1319_v34  ;;  %v1321_v4 = vadd.f32 %v1698_v19, %v1317_v30 }
 0x530   : > { %1324 = vst [vmem:[%s191_s8 + $0x8] sm:$0xff] %v1320_v17  ;;  %v1322_v26 = vadd.f32 %v1699_v7, %v1318_v9 }
 0x531   : > { %1325 = vst [vmem:[%s191_s8 + $0x10] sm:$0xff] %v1321_v4 }
 0x532   : > { %1326 = vst [vmem:[%s191_s8 + $0x18] sm:$0xff] %v1322_v26 }
 0x533   : > { %1713 = shalt.err (!%p1710_p3)
}
 0x534   : > { %s1714_s10 = scalar_lea.hbm %s2496_s14, 512  ;;  %s1718_s29 = scalar_lea.hbm %s2543_s4, 1024 }
 0x535   : > { %p1715_p4 = scmp.ne.s32.totalorder %s2496_s14, %s1714_s10  ;;  %p1719_p9 = scmp.lt.u32.totalorder %s2496_s14, %s2543_s4 }
 0x536   : > { %p1720_p10 = scmp.lt.u32.totalorder %s1718_s29, %s1714_s10  ;;  %p1722_p12 = scmp.lt.u32.totalorder %s1714_s10, %s2496_s14 }
 0x537   : > { %p1716_p7 = pnand %p1715_p4, %p1835_p5 }
 0x538   : > { %p1721_p11 = por %p1720_p10, %p1719_p9 }
 0x539   : > { %p1717_p8 = pneg %p1716_p7 }
 0x53a   : > { %p1723_p13 = por %p1722_p12, %p1721_p11 }
 0x53c   : > { %p1724_p0 = pnand %p1723_p13, %p1717_p8 }
 0x53e   : > { %1727 = shalt.err (!%p1724_p0)
}
 0x53f   : > { %s1767_s6 = smov 256   ;;  %s1768_s7 = smov 16  }
 0x540   : > { %1459 = dma.vmem_to_hbm [thread:$0]  (%p1835_p5), %s2489_s9, 512, %s2496_s14, %s2498_s0, %s1767_s6, %s1767_s6, %s1768_s7  }
 0x541 PF: > { %p1465_p1 = scmp.ge.s32.totalorder %s1762_s20, 2  ;;  %s1356_s8 = sand.u32 1, %s1750_s17  }
 0x542   : > { %s1357_s11 = scalar_lea.sflag [#allocation4], %s1356_s8 }
 0x543   : > { %p1462_p2 = pnand %p1465_p1, %p1839_p6 }
 0x545   : > { %1745 = dma.done.wait (!%p1462_p2), %s1357_s11, 512  }
 0x546   : > { %1747 = vsyncadd (!%p1462_p2), %s1357_s11, 4294966784  ;;  %p15_p3 = scmp.ge.s32.totalorder %s1822_s22, 4   ;;  %s2626_s17 = smov %s1754_s18 }
 0x547   : > { %s2627_s18 = smov %s1758_s19  ;;  %s2628_s19 = smov %s1833_s25 }
 0x548   : > { %s2629_s20 = smov %s1822_s22  ;;  %17 = sbr.rel (!%p15_p3) target bundleno = 5 (0x5), region = 71 }
 0x54f   :  { %1362 = vsyncpa [#allocation4], 1 }
 0x550   :  { %1364 = vsyncpa [#allocation4 + $0x1], 1 }

</bundles_post_ra>
